<compile_context>
chip_gen: v7x
topology: tpu7x:2x2x1
jax: 0.10.0
libtpu: 0.0.40
codegen_flags: <defaults>
</compile_context>

<pallas_src>
import functools

import jax
import jax.numpy as jnp
from jax import lax
from jax.experimental import pallas as pl
from jax.experimental.pallas import tpu as pltpu

LANE = 128
NEG_BIG = -1e30


def _round_up(x, m):
    return (x + m - 1) // m * m


def _vmem_budget_bytes():
    """Per-generation scoped-VMEM budget: ~70% of physical per-core VMEM."""
    cap = 64 * 1024 * 1024  # conservative fallback == v7x physical VMEM
    try:
        info = pltpu.get_tpu_info()
        cap = int(getattr(info, "vmem_capacity_bytes", cap))
    except Exception:
        pass
    return int(cap * 0.7)


def _pick_tile(n):
    """Largest tile (DMA amortization) keeping >=4 row tiles / <=~25% padding."""
    for t in (512, 256, 128):
        if n >= 4 * t:
            return t
    return 128


def _pad_inputs(a_hat, x, w1, b1, w2, b2, n_pad, f_pad, h_pad, c_pad):
    """Zero padding is exact: zero A rows/cols and zero W/b entries are no-ops."""
    n, f = x.shape
    h = w1.shape[1]
    c = w2.shape[1]
    a_p = jnp.zeros((n_pad, n_pad), jnp.bfloat16).at[:n, :n].set(
        a_hat.astype(jnp.bfloat16))
    x_p = jnp.zeros((n_pad, f_pad), jnp.bfloat16).at[:n, :f].set(
        x.astype(jnp.bfloat16))
    w1_p = jnp.zeros((f_pad, h_pad), jnp.bfloat16).at[:f, :h].set(
        w1.astype(jnp.bfloat16))
    b1_p = jnp.zeros((1, h_pad), jnp.float32).at[:, :h].set(b1.reshape(1, -1))
    w2_p = jnp.zeros((h_pad, c_pad), jnp.bfloat16).at[:h, :c].set(
        w2.astype(jnp.bfloat16))
    b2_p = jnp.zeros((1, c_pad), jnp.float32).at[:, :c].set(b2.reshape(1, -1))
    return a_p, x_p, w1_p, b1_p, w2_p, b2_p


# --------------------------------------------------------------------------
# Small-graph fast path: A_hat resident in VMEM, both GCN layers in one kernel.
# --------------------------------------------------------------------------
def _fused_small_kernel(a_ref, x_ref, w1_ref, b1_ref, w2_ref, b2_ref, o_ref, *,
                        valid_cols):
    a = a_ref[...]
    xw1 = jnp.dot(x_ref[...], w1_ref[...], preferred_element_type=jnp.float32)
    h1 = jnp.maximum(
        jnp.dot(a, xw1.astype(a.dtype), preferred_element_type=jnp.float32)
        + b1_ref[...], 0.0)
    hw2 = jnp.dot(h1.astype(w2_ref.dtype), w2_ref[...],
                  preferred_element_type=jnp.float32)
    z = jnp.dot(a, hw2.astype(a.dtype), preferred_element_type=jnp.float32) \
        + b2_ref[...]
    col = lax.broadcasted_iota(jnp.int32, z.shape, 1)
    z = jnp.where(col < valid_cols, z, NEG_BIG)
    m = jnp.max(z, axis=1, keepdims=True)
    s = z - m
    lse = jnp.log(jnp.sum(jnp.exp(s), axis=1, keepdims=True))
    o_ref[...] = (s - lse).astype(o_ref.dtype)


def _gcn2_fused_small(a_p, x_p, w1_p, b1_p, w2_p, b2_p, *, valid_cols,
                      vmem_limit):
    n_pad = a_p.shape[0]
    f_pad = x_p.shape[1]
    h_pad = w1_p.shape[1]
    c_pad = w2_p.shape[1]
    kernel = functools.partial(_fused_small_kernel, valid_cols=valid_cols)
    return pl.pallas_call(
        kernel,
        out_shape=jax.ShapeDtypeStruct((n_pad, c_pad), jnp.float32),
        grid_spec=pltpu.PrefetchScalarGridSpec(
            num_scalar_prefetch=0,
            grid=(1,),
            in_specs=[
                pl.BlockSpec((n_pad, n_pad), lambda i: (0, 0)),
                pl.BlockSpec((n_pad, f_pad), lambda i: (0, 0)),
                pl.BlockSpec((f_pad, h_pad), lambda i: (0, 0)),
                pl.BlockSpec((1, h_pad), lambda i: (0, 0)),
                pl.BlockSpec((h_pad, c_pad), lambda i: (0, 0)),
                pl.BlockSpec((1, c_pad), lambda i: (0, 0)),
            ],
            out_specs=pl.BlockSpec((n_pad, c_pad), lambda i: (0, 0)),
        ),
        compiler_params=pltpu.CompilerParams(
            dimension_semantics=("arbitrary",),
            vmem_limit_bytes=vmem_limit,
        ),
    )(a_p, x_p, w1_p, b1_p, w2_p, b2_p)


# --------------------------------------------------------------------------
# Tiled path, kernel 1: hoisted feature transform  XW = X @ W  (row-tiled)
# --------------------------------------------------------------------------
def _feat_xform_kernel(x_ref, w_ref, o_ref):
    o_ref[...] = jnp.dot(
        x_ref[...], w_ref[...], preferred_element_type=jnp.float32
    ).astype(o_ref.dtype)


def _feat_xform(x, w, *, tm, vmem_limit):
    n, f = x.shape
    _, h = w.shape
    return pl.pallas_call(
        _feat_xform_kernel,
        out_shape=jax.ShapeDtypeStruct((n, h), jnp.bfloat16),
        grid_spec=pltpu.PrefetchScalarGridSpec(
            num_scalar_prefetch=0,
            grid=(n // tm,),
            in_specs=[
                pl.BlockSpec((tm, f), lambda i: (i, 0)),
                pl.BlockSpec((f, h), lambda i: (0, 0)),      # W resident
            ],
            out_specs=pl.BlockSpec((tm, h), lambda i: (i, 0)),
        ),
        compiler_params=pltpu.CompilerParams(
            dimension_semantics=("parallel",),
            vmem_limit_bytes=vmem_limit,
        ),
    )(x, w)


# --------------------------------------------------------------------------
# Tiled path, kernel 2: layer-1 propagation + fused h1 @ W2
#   O = relu(A_hat @ H + b1) @ W2
# --------------------------------------------------------------------------
def _prop1_kernel(a_ref, h_ref, b1_ref, w2_ref, o_ref, acc_ref, *, tk,
                  h_resident):
    k = pl.program_id(1)

    @pl.when(k == 0)
    def _():
        acc_ref[...] = jnp.zeros_like(acc_ref)

    if h_resident:
        off = pl.multiple_of(k * tk, tk)
        h_tile = h_ref[pl.ds(off, tk), :]
    else:
        h_tile = h_ref[...]
    acc_ref[...] += jnp.dot(a_ref[...], h_tile,
                            preferred_element_type=jnp.float32)

    @pl.when(k == pl.num_programs(1) - 1)
    def _():
        h1 = jnp.maximum(acc_ref[...] + b1_ref[...], 0.0)
        o_ref[...] = jnp.dot(
            h1.astype(w2_ref.dtype), w2_ref[...],
            preferred_element_type=jnp.float32,
        ).astype(o_ref.dtype)


def _propagate_relu_w2(a, h, b1, w2, *, tm, tk, h_resident, vmem_limit):
    n = a.shape[0]
    hcols = h.shape[1]
    ccols = w2.shape[1]
    if h_resident:
        h_spec = pl.BlockSpec((n, hcols), lambda i, k: (0, 0))   # fetched once
    else:
        h_spec = pl.BlockSpec((tk, hcols), lambda i, k: (k, 0))  # streamed
    kernel = functools.partial(_prop1_kernel, tk=tk, h_resident=h_resident)
    return pl.pallas_call(
        kernel,
        out_shape=jax.ShapeDtypeStruct((n, ccols), jnp.bfloat16),
        grid_spec=pltpu.PrefetchScalarGridSpec(
            num_scalar_prefetch=0,
            grid=(n // tm, n // tk),
            in_specs=[
                pl.BlockSpec((tm, tk), lambda i, k: (i, k)),     # A_hat tile
                h_spec,
                pl.BlockSpec((1, hcols), lambda i, k: (0, 0)),   # b1
                pl.BlockSpec((hcols, ccols), lambda i, k: (0, 0)),  # W2 resident
            ],
            out_specs=pl.BlockSpec((tm, ccols), lambda i, k: (i, 0)),
            scratch_shapes=[pltpu.VMEM((tm, hcols), jnp.float32)],
        ),
        compiler_params=pltpu.CompilerParams(
            dimension_semantics=("parallel", "arbitrary"),
            vmem_limit_bytes=vmem_limit,
        ),
    )(a, h, b1, w2)


# --------------------------------------------------------------------------
# Tiled path, kernel 3: layer-2 propagation + masked log_softmax
#   O = log_softmax(A_hat @ H + b2)
# --------------------------------------------------------------------------
def _prop2_kernel(a_ref, h_ref, b2_ref, o_ref, acc_ref, *, tk, h_resident,
                  valid_cols):
    k = pl.program_id(1)

    @pl.when(k == 0)
    def _():
        acc_ref[...] = jnp.zeros_like(acc_ref)

    if h_resident:
        off = pl.multiple_of(k * tk, tk)
        h_tile = h_ref[pl.ds(off, tk), :]
    else:
        h_tile = h_ref[...]
    acc_ref[...] += jnp.dot(a_ref[...], h_tile,
                            preferred_element_type=jnp.float32)

    @pl.when(k == pl.num_programs(1) - 1)
    def _():
        z = acc_ref[...] + b2_ref[...]
        # Mask padded class columns so they don't corrupt the normalizer.
        col = lax.broadcasted_iota(jnp.int32, z.shape, 1)
        z = jnp.where(col < valid_cols, z, NEG_BIG)
        m = jnp.max(z, axis=1, keepdims=True)
        s = z - m
        lse = jnp.log(jnp.sum(jnp.exp(s), axis=1, keepdims=True))
        o_ref[...] = (s - lse).astype(o_ref.dtype)


def _propagate_logsoftmax(a, h, b2, *, tm, tk, h_resident, valid_cols,
                          vmem_limit):
    n = a.shape[0]
    cols = h.shape[1]
    if h_resident:
        h_spec = pl.BlockSpec((n, cols), lambda i, k: (0, 0))
    else:
        h_spec = pl.BlockSpec((tk, cols), lambda i, k: (k, 0))
    kernel = functools.partial(_prop2_kernel, tk=tk, h_resident=h_resident,
                               valid_cols=valid_cols)
    return pl.pallas_call(
        kernel,
        out_shape=jax.ShapeDtypeStruct((n, cols), jnp.float32),
        grid_spec=pltpu.PrefetchScalarGridSpec(
            num_scalar_prefetch=0,
            grid=(n // tm, n // tk),
            in_specs=[
                pl.BlockSpec((tm, tk), lambda i, k: (i, k)),
                h_spec,
                pl.BlockSpec((1, cols), lambda i, k: (0, 0)),
            ],
            out_specs=pl.BlockSpec((tm, cols), lambda i, k: (i, 0)),
            scratch_shapes=[pltpu.VMEM((tm, cols), jnp.float32)],
        ),
        compiler_params=pltpu.CompilerParams(
            dimension_semantics=("parallel", "arbitrary"),
            vmem_limit_bytes=vmem_limit,
        ),
    )(a, h, b2)


# --------------------------------------------------------------------------
# Wrapper: pad to TPU-friendly shapes, dispatch fast/tiled path, strip padding
# --------------------------------------------------------------------------
def gcn2_forward(a_hat, x, w1, b1, w2, b2, *, fast_path_max_n=2048,
                 h_resident=None):
    n, f = x.shape
    h = w1.shape[1]
    c = w2.shape[1]

    f_pad = _round_up(f, LANE)
    h_pad = _round_up(h, LANE)
    c_pad = _round_up(c, LANE)

    vmem_limit = _vmem_budget_bytes()

    # ---- small-graph fast path: everything (incl. A_hat) VMEM-resident -----
    n_pad_small = _round_up(n, LANE)
    fast_bytes = (
        2 * (n_pad_small * n_pad_small + n_pad_small * f_pad
             + f_pad * h_pad + h_pad * c_pad) * 2          # bf16 inputs (x2 bufs)
        + 2 * n_pad_small * c_pad * 4                       # f32 output (x2 bufs)
        + n_pad_small * (f_pad + 3 * h_pad + 3 * c_pad) * 4  # f32 temporaries
    )
    if n <= fast_path_max_n and fast_bytes <= int(vmem_limit * 0.8):
        a_p, x_p, w1_p, b1_p, w2_p, b2_p = _pad_inputs(
            a_hat, x, w1, b1, w2, b2, n_pad_small, f_pad, h_pad, c_pad)
        out = _gcn2_fused_small(a_p, x_p, w1_p, b1_p, w2_p, b2_p,
                                valid_cols=c, vmem_limit=vmem_limit)
        return out[:n, :c]

    # ---- tiled path ---------------------------------------------------------
    tile = _pick_tile(n)
    n_pad = _round_up(n, tile)
    tm = tk = tile

    a_p, x_p, w1_p, b1_p, w2_p, b2_p = _pad_inputs(
        a_hat, x, w1, b1, w2, b2, n_pad, f_pad, h_pad, c_pad)

    # Keep the (N,128) propagated operand VMEM-resident unless it would eat
    # too much of the per-core budget (x2 accounts for double-buffering).
    if h_resident is None:
        h_resident = (2 * n_pad * max(h_pad, c_pad) * 2) <= int(vmem_limit * 0.4)

    # layer 1 feature transform (dropout == identity in inference)
    xw1 = _feat_xform(x_p, w1_p, tm=tm, vmem_limit=vmem_limit)
    # layer 1 propagation + ReLU + fused h1 @ W2  ->  (n_pad, c_pad) bf16
    hw2 = _propagate_relu_w2(a_p, xw1, b1_p, w2_p, tm=tm, tk=tk,
                             h_resident=h_resident, vmem_limit=vmem_limit)
    # layer 2 propagation + bias + masked log_softmax
    out = _propagate_logsoftmax(a_p, hw2, b2_p, tm=tm, tk=tk,
                                h_resident=h_resident, valid_cols=c,
                                vmem_limit=vmem_limit)
    return out[:n, :c]


# --------------------------------------------------------------------------
# Glue: dense normalized adjacency, parameter init, plain-JAX reference
# --------------------------------------------------------------------------
def build_norm_adj(edge_index, num_nodes):
    """Dense D^{-1/2}(A+I)D^{-1/2} from an edge_index of shape (2, E).

    Note: duplicate edges are deduplicated (0/1 adjacency); torch_geometric's
    gcn_norm would scatter-add duplicate edge weights. Glue code only.
    """
    src, dst = edge_index[0], edge_index[1]
    a = jnp.zeros((num_nodes, num_nodes), jnp.float32)
    a = a.at[src, dst].set(1.0)
    a = a.at[dst, src].set(1.0)                                   # undirected
    a = jnp.maximum(a, jnp.eye(num_nodes, dtype=jnp.float32))     # self loops
    deg = jnp.sum(a, axis=1)
    d_inv_sqrt = 1.0 / jnp.sqrt(deg)
    return a * d_inv_sqrt[:, None] * d_inv_sqrt[None, :]


def glorot(key, shape):
    fan_in, fan_out = shape
    limit = jnp.sqrt(6.0 / (fan_in + fan_out))
    return jax.random.uniform(key, shape, jnp.float32, -limit, limit)


def reference_forward(a_hat, x, w1, b1, w2, b2):
    h1 = jnp.maximum(a_hat @ (x @ w1) + b1, 0.0)
    z = a_hat @ (h1 @ w2) + b2
    return jax.nn.log_softmax(z, axis=1)


if __name__ == "__main__":
    key = jax.random.PRNGKey(0)
    k_x, k_e, k_w1, k_w2 = jax.random.split(key, 4)

    # Small synthetic graph, consistent with GCNNet2(dataset, hidden_num, out_num).
    # Deliberately non-multiples of 128 to exercise padding + stripping.
    num_nodes = 200          # N
    num_feats = 16           # dataset.num_node_features
    hidden_num = 64
    out_num = 7
    num_edges = 600

    x = jax.random.normal(k_x, (num_nodes, num_feats), jnp.float32)
    edge_index = jax.random.randint(k_e, (2, num_edges), 0, num_nodes)
    a_hat = build_norm_adj(edge_index, num_nodes)

    w1 = glorot(k_w1, (num_feats, hidden_num))
    b1 = jnp.zeros((hidden_num,), jnp.float32)
    w2 = glorot(k_w2, (hidden_num, out_num))
    b2 = jnp.zeros((out_num,), jnp.float32)

    ref = reference_forward(a_hat, x, w1, b1[None, :], w2, b2[None, :])

    # Path 1: small-graph fused fast path (A_hat resident in VMEM).
    out_fast = jax.block_until_ready(gcn2_forward(a_hat, x, w1, b1, w2, b2))
    # Path 2: tiled path with VMEM-resident H (forced, exercises big-graph code).
    out_tiled = jax.block_until_ready(
        gcn2_forward(a_hat, x, w1, b1, w2, b2, fast_path_max_n=0))
    # Path 3: tiled path with streamed H tiles (very-large-graph fallback).
    out_stream = jax.block_until_ready(
        gcn2_forward(a_hat, x, w1, b1, w2, b2, fast_path_max_n=0,
                     h_resident=False))

    for out in (out_fast, out_tiled, out_stream):
        # Sanity 1: shape and exact log_softmax property (rows of exp sum to 1).
        assert out.shape == (num_nodes, out_num)
        row_sums = jnp.exp(out).sum(axis=1)
        assert bool(jnp.all(jnp.abs(row_sums - 1.0) < 1e-4))
        # Sanity 2: matches the f32 plain-JAX reference within bf16 tolerance.
        max_err = float(jnp.max(jnp.abs(out - ref)))
        assert max_err < 1e-1, f"max abs err vs reference: {max_err}"

    print("KERNEL_OK")
</pallas_src>

<mosaic_0001>
module attributes {stable_mosaic.version = 11 : i64} {
  func.func @_fused_small_kernel(%arg0: i32, %arg1: memref<256x256xbf16, #tpu.memory_space<vmem>>, %arg2: memref<256x128xbf16, #tpu.memory_space<vmem>>, %arg3: memref<128x128xbf16, #tpu.memory_space<vmem>>, %arg4: memref<1x128xf32, #tpu.memory_space<vmem>>, %arg5: memref<128x128xbf16, #tpu.memory_space<vmem>>, %arg6: memref<1x128xf32, #tpu.memory_space<vmem>>, %arg7: memref<256x128xf32, #tpu.memory_space<vmem>>) attributes {dimension_semantics = [#tpu.dimension_semantics<arbitrary>], iteration_bounds = array<i64: 1>, scalar_prefetch = 0 : i64, scratch_operands = 0 : i64, tpu.core_type = #tpu.core_type<tc>, window_params = [{pipeline_mode = #tpu.pipeline_mode<synchronous>, transform_indices = @transform_0, window_bounds = array<i64: 256, 256>}, {pipeline_mode = #tpu.pipeline_mode<synchronous>, transform_indices = @transform_1, window_bounds = array<i64: 256, 128>}, {pipeline_mode = #tpu.pipeline_mode<synchronous>, transform_indices = @transform_2, window_bounds = array<i64: 128, 128>}, {pipeline_mode = #tpu.pipeline_mode<synchronous>, transform_indices = @transform_3, window_bounds = array<i64: 1, 128>}, {pipeline_mode = #tpu.pipeline_mode<synchronous>, transform_indices = @transform_4, window_bounds = array<i64: 128, 128>}, {pipeline_mode = #tpu.pipeline_mode<synchronous>, transform_indices = @transform_5, window_bounds = array<i64: 1, 128>}, {pipeline_mode = #tpu.pipeline_mode<synchronous>, transform_indices = @transform_6, window_bounds = array<i64: 256, 128>}]} {
    %c0 = arith.constant 0 : index
    %c0_0 = arith.constant 0 : index
    %0 = vector.load %arg1[%c0, %c0_0] : memref<256x256xbf16, #tpu.memory_space<vmem>>, vector<256x256xbf16>
    %c0_1 = arith.constant 0 : index
    %c0_2 = arith.constant 0 : index
    %1 = vector.load %arg2[%c0_1, %c0_2] : memref<256x128xbf16, #tpu.memory_space<vmem>>, vector<256x128xbf16>
    %c0_3 = arith.constant 0 : index
    %c0_4 = arith.constant 0 : index
    %2 = vector.load %arg3[%c0_3, %c0_4] : memref<128x128xbf16, #tpu.memory_space<vmem>>, vector<128x128xbf16>
    %cst = arith.constant dense<0.000000e+00> : vector<256x128xf32>
    %3 = tpu.matmul %1, %2, %cst {dimension_numbers = #tpu.dot_dimension_numbers<[1], [0], [0], [1], [0, 0, 1, 1], [], []>} : vector<256x128xbf16>, vector<128x128xbf16>, vector<256x128xf32> -> vector<256x128xf32>
    %4 = arith.truncf %3 : vector<256x128xf32> to vector<256x128xbf16>
    %cst_5 = arith.constant dense<0.000000e+00> : vector<256x128xf32>
    %5 = tpu.matmul %0, %4, %cst_5 {dimension_numbers = #tpu.dot_dimension_numbers<[1], [0], [0], [1], [0, 0, 1, 1], [], []>} : vector<256x256xbf16>, vector<256x128xbf16>, vector<256x128xf32> -> vector<256x128xf32>
    %c0_6 = arith.constant 0 : index
    %c0_7 = arith.constant 0 : index
    %6 = vector.load %arg4[%c0_6, %c0_7] : memref<1x128xf32, #tpu.memory_space<vmem>>, vector<1x128xf32>
    %7 = vector.broadcast %6 : vector<1x128xf32> to vector<256x128xf32>
    %8 = arith.addf %5, %7 : vector<256x128xf32>
    %cst_8 = arith.constant 0.000000e+00 : f32
    %9 = vector.broadcast %cst_8 : f32 to vector<256x128xf32>
    %10 = arith.maximumf %8, %9 : vector<256x128xf32>
    %11 = arith.truncf %10 : vector<256x128xf32> to vector<256x128xbf16>
    %c0_9 = arith.constant 0 : index
    %c0_10 = arith.constant 0 : index
    %12 = vector.load %arg5[%c0_9, %c0_10] : memref<128x128xbf16, #tpu.memory_space<vmem>>, vector<128x128xbf16>
    %cst_11 = arith.constant dense<0.000000e+00> : vector<256x128xf32>
    %13 = tpu.matmul %11, %12, %cst_11 {dimension_numbers = #tpu.dot_dimension_numbers<[1], [0], [0], [1], [0, 0, 1, 1], [], []>} : vector<256x128xbf16>, vector<128x128xbf16>, vector<256x128xf32> -> vector<256x128xf32>
    %14 = arith.truncf %13 : vector<256x128xf32> to vector<256x128xbf16>
    %cst_12 = arith.constant dense<0.000000e+00> : vector<256x128xf32>
    %15 = tpu.matmul %0, %14, %cst_12 {dimension_numbers = #tpu.dot_dimension_numbers<[1], [0], [0], [1], [0, 0, 1, 1], [], []>} : vector<256x256xbf16>, vector<256x128xbf16>, vector<256x128xf32> -> vector<256x128xf32>
    %c0_13 = arith.constant 0 : index
    %c0_14 = arith.constant 0 : index
    %16 = vector.load %arg6[%c0_13, %c0_14] : memref<1x128xf32, #tpu.memory_space<vmem>>, vector<1x128xf32>
    %17 = vector.broadcast %16 : vector<1x128xf32> to vector<256x128xf32>
    %18 = arith.addf %15, %17 : vector<256x128xf32>
    %19 = tpu.iota {dimensions = array<i32: 1>} : vector<256x128xi32>
    %c7_i32 = arith.constant 7 : i32
    %20 = vector.broadcast %c7_i32 : i32 to vector<256x128xi32>
    %21 = arith.cmpi slt, %19, %20 : vector<256x128xi32>
    %cst_15 = arith.constant -1.000000e+30 : f32
    %22 = vector.broadcast %cst_15 : f32 to vector<256x128xf32>
    %23 = arith.select %21, %18, %22 : vector<256x128xi1>, vector<256x128xf32>
    %cst_16 = arith.constant dense<0xFF800000> : vector<256xf32>
    %24 = vector.multi_reduction <maximumf>, %23, %cst_16 [1] : vector<256x128xf32> to vector<256xf32>
    %25 = vector.shape_cast %24 : vector<256xf32> to vector<256x1xf32>
    %26 = vector.broadcast %25 : vector<256x1xf32> to vector<256x128xf32>
    %27 = arith.subf %23, %26 : vector<256x128xf32>
    %28 = math.exp %27 : vector<256x128xf32>
    %cst_17 = arith.constant dense<0.000000e+00> : vector<256xf32>
    %29 = vector.multi_reduction <add>, %28, %cst_17 [1] : vector<256x128xf32> to vector<256xf32>
    %30 = vector.shape_cast %29 : vector<256xf32> to vector<256x1xf32>
    %31 = math.log %30 : vector<256x1xf32>
    %32 = vector.broadcast %31 : vector<256x1xf32> to vector<256x128xf32>
    %33 = arith.subf %27, %32 : vector<256x128xf32>
    %c0_18 = arith.constant 0 : index
    %c0_19 = arith.constant 0 : index
    %34 = vector.load %arg7[%c0_18, %c0_19] : memref<256x128xf32, #tpu.memory_space<vmem>>, vector<256x128xf32>
    tpu.vector_store %arg7[%c0_18, %c0_19], %33 {strides = array<i32>} : memref<256x128xf32, #tpu.memory_space<vmem>>, vector<256x128xf32>,
    return
  }
  func.func @transform_0(%arg0: i32) -> (i32, i32) {
    %c0_i32 = arith.constant 0 : i32
    %c0_i32_0 = arith.constant 0 : i32
    %c0_i32_1 = arith.constant 0 : i32
    return %c0_i32, %c0_i32_0 : i32, i32
  }
  func.func @transform_1(%arg0: i32) -> (i32, i32) {
    %c0_i32 = arith.constant 0 : i32
    %c0_i32_0 = arith.constant 0 : i32
    %c0_i32_1 = arith.constant 0 : i32
    return %c0_i32, %c0_i32_0 : i32, i32
  }
  func.func @transform_2(%arg0: i32) -> (i32, i32) {
    %c0_i32 = arith.constant 0 : i32
    %c0_i32_0 = arith.constant 0 : i32
    %c0_i32_1 = arith.constant 0 : i32
    return %c0_i32, %c0_i32_0 : i32, i32
  }
  func.func @transform_3(%arg0: i32) -> (i32, i32) {
    %c0_i32 = arith.constant 0 : i32
    %c0_i32_0 = arith.constant 0 : i32
    %c0_i32_1 = arith.constant 0 : i32
    return %c0_i32, %c0_i32_0 : i32, i32
  }
  func.func @transform_4(%arg0: i32) -> (i32, i32) {
    %c0_i32 = arith.constant 0 : i32
    %c0_i32_0 = arith.constant 0 : i32
    %c0_i32_1 = arith.constant 0 : i32
    return %c0_i32, %c0_i32_0 : i32, i32
  }
  func.func @transform_5(%arg0: i32) -> (i32, i32) {
    %c0_i32 = arith.constant 0 : i32
    %c0_i32_0 = arith.constant 0 : i32
    %c0_i32_1 = arith.constant 0 : i32
    return %c0_i32, %c0_i32_0 : i32, i32
  }
  func.func @transform_6(%arg0: i32) -> (i32, i32) {
    %c0_i32 = arith.constant 0 : i32
    %c0_i32_0 = arith.constant 0 : i32
    %c0_i32_1 = arith.constant 0 : i32
    return %c0_i32, %c0_i32_0 : i32, i32
  }
}

</mosaic_0001>

<bundles_post_ra>
// kernel: tpu_custom_call.1
= control target key start
LH: loop header
LB: loop body
LE: loop exit
PB: predicated region body
PF: predicated region fallthrough
CT: control target
= control target key end

     0   :  { %11 = vsyncpa [#allocation3], 0  ;;  %s3092_s0 = inlined_call_operand.hbm [shape: bf16[256,256], index: 0, kind: input, shape index: {}]   ;;  %s3093_s1 = inlined_call_operand.hbm [shape: bf16[256,128], index: 1, kind: input, shape index: {}]   ;;  %s3094_s2 = inlined_call_operand.hbm [shape: bf16[128,128], index: 2, kind: input, shape index: {}]   ;;  %s3095_s3 = inlined_call_operand.vmem [shape: f32[1,128], index: 3, kind: input, shape index: {}]   ;;  %s3096_s4 = inlined_call_operand.hbm [shape: bf16[128,128], index: 4, kind: input, shape index: {}]   ;;  %s3097_s5 = inlined_call_operand.vmem [shape: f32[1,128], index: 5, kind: input, shape index: {}]   ;;  %s3098_s6 = inlined_call_operand.hbm [shape: f32[256,128], index: 6, kind: output, shape index: {}]  }
   0x1   :  { %12 = vsyncpa [#allocation6], 0 }
   0x2   :  { %13 = vsyncpa [#allocation9], 0 }
   0x3   :  { %14 = vsyncpa [#allocation4], 0  ;;  %s2441_s21 = smov [#allocation5]   ;;  %s2323_s25 = scalar_lea.hbm %s3093_s1, 2048 }
   0x4   :  { %s32_s22 = sshll.u32 %s2441_s21, 4  ;;  %p2324_p0 = scmp.ne.s32.totalorder %s3093_s1, %s2323_s25  ;;  %s33_s22 = int_to_ptr.vmem [resolvable:$true] %s32_s22 }
   0x5   :  { %p2327_p1 = scmp.lt.u32.totalorder %s2323_s25, %s3093_s1 }
   0x7   :  { %p2329_p2 = pnand %p2327_p1, %p2324_p0 }
   0x9   :  { %2332 = shalt.err (!%p2329_p2)
}
   0xa   :  { %s2333_s30 = scalar_lea.vmem %s33_s22, 2048  ;;  %p2338_p4 = scmp.lt.s32.totalorder %s33_s22, %s33_s22 }
   0xb   :  { %p2334_p3 = scmp.ne.s32.totalorder %s33_s22, %s2333_s30  ;;  %p2339_p5 = scmp.lt.s32.totalorder %s2333_s30, %s2333_s30 }
   0xd   :  { %p2340_p6 = por %p2339_p5, %p2338_p4 }
   0xf   :  { %p2341_p7 = pnand %p2340_p6, %p2334_p3 }
  0x11   :  { %2344 = shalt.err (!%p2341_p7)
}
  0x12   :  { %s2442_s7 = smov 64   ;;  %s2443_s8 = smov 4  }
  0x13   :  { %38 = dma.hbm_to_vmem [thread:$0]  %s3093_s1, 2048, %s33_s22, [#allocation6], %s2442_s7, %s2442_s7, %s2443_s8  }
  0x14   :  { %s2444_s11 = smov [#allocation2]   ;;  %s2345_s15 = scalar_lea.hbm %s3092_s0, 4096 }
  0x15   :  { %s20_s12 = sshll.u32 %s2444_s11, 4  ;;  %p2346_p8 = scmp.ne.s32.totalorder %s3092_s0, %s2345_s15  ;;  %s21_s12 = int_to_ptr.vmem [resolvable:$true] %s20_s12 }
  0x16   :  { %p2349_p9 = scmp.lt.u32.totalorder %s2345_s15, %s3092_s0 }
  0x18   :  { %p2351_p10 = pnand %p2349_p9, %p2346_p8 }
  0x1a   :  { %2354 = shalt.err (!%p2351_p10)
}
  0x1b   :  { %s2355_s20 = scalar_lea.vmem %s21_s12, 4096  ;;  %p2360_p12 = scmp.lt.s32.totalorder %s21_s12, %s21_s12 }
  0x1c   :  { %p2356_p11 = scmp.ne.s32.totalorder %s21_s12, %s2355_s20  ;;  %p2361_p13 = scmp.lt.s32.totalorder %s2355_s20, %s2355_s20 }
  0x1e   :  { %p2362_p0 = por %p2361_p13, %p2360_p12 }
  0x20   :  { %p2363_p1 = pnand %p2362_p0, %p2356_p11 }
  0x22   :  { %2366 = shalt.err (!%p2363_p1)
}
  0x23   :  { %s2445_s1 = smov 128   ;;  %s2446_s21 = smov 8  }
  0x24   :  { %26 = dma.hbm_to_vmem [thread:$0]  %s3092_s0, 4096, %s21_s12, [#allocation3], %s2445_s1, %s2445_s1, %s2446_s21  }
  0x25   :  { %s2447_s24 = smov [#allocation7]   ;;  %s2448_s26 = smov [#allocation8]  }
  0x26   :  { %s44_s25 = sshll.u32 %s2447_s24, 4  ;;  %s58_s27 = sshll.u32 %s2448_s26, 4  ;;  %s45_s25 = int_to_ptr.vmem [resolvable:$true] %s44_s25  ;;  %s2515_s27 = int_to_ptr.vmem [resolvable:$true] %s58_s27 }
  0x27   :  { %s2367_s30 = scalar_lea.hbm %s3094_s2, 1024 }
  0x28   :  { %p2368_p2 = scmp.ne.s32.totalorder %s3094_s2, %s2367_s30  ;;  %p2371_p3 = scmp.lt.u32.totalorder %s2367_s30, %s3094_s2 }
  0x2a   :  { %p2373_p4 = pnand %p2371_p3, %p2368_p2 }
  0x2c   :  { %2376 = shalt.err (!%p2373_p4)
}
  0x2d   :  { %s2377_s0 = scalar_lea.vmem %s45_s25, 1024  ;;  %p2382_p6 = scmp.lt.s32.totalorder %s45_s25, %s45_s25 }
  0x2e   :  { %p2378_p5 = scmp.ne.s32.totalorder %s45_s25, %s2377_s0  ;;  %p2383_p7 = scmp.lt.s32.totalorder %s2377_s0, %s2377_s0 }
  0x30   :  { %p2384_p8 = por %p2383_p7, %p2382_p6 }
  0x32   :  { %p2385_p9 = pnand %p2384_p8, %p2378_p5 }
  0x34   :  { %2388 = shalt.err (!%p2385_p9)
}
  0x35   :  { %50 = dma.hbm_to_vmem [thread:$0]  %s3094_s2, 1024, %s45_s25, [#allocation6], %s2442_s7, %s2442_s7, %s2443_s8  }
  0x36   :  { %s2389_s17 = scalar_lea.hbm %s3096_s4, 1024 }
  0x37   :  { %p2390_p10 = scmp.ne.s32.totalorder %s3096_s4, %s2389_s17  ;;  %p2393_p11 = scmp.lt.u32.totalorder %s2389_s17, %s3096_s4 }
  0x39   :  { %p2395_p12 = pnand %p2393_p11, %p2390_p10 }
  0x3b   :  { %2398 = shalt.err (!%p2395_p12)
}
  0x3c   :  { %s2399_s23 = scalar_lea.vmem %s2515_s27, 1024  ;;  %p2404_p0 = scmp.lt.s32.totalorder %s2515_s27, %s2515_s27 }
  0x3d   :  { %p2400_p13 = scmp.ne.s32.totalorder %s2515_s27, %s2399_s23  ;;  %p2405_p1 = scmp.lt.s32.totalorder %s2399_s23, %s2399_s23 }
  0x3f   :  { %p2406_p2 = por %p2405_p1, %p2404_p0 }
  0x41   :  { %p2407_p3 = pnand %p2406_p2, %p2400_p13 }
  0x43   :  { %2410 = shalt.err (!%p2407_p3)
}
  0x44   :  { %64 = dma.hbm_to_vmem [thread:$0]  %s3096_s4, 1024, %s2515_s27, [#allocation9], %s2442_s7, %s2442_s7, %s2443_s8  }
  0x45   :  { %2433 = dma.done.wait [#allocation3], 4096  }
  0x46   :  { %2434 = vsyncadd [#allocation3], 4294963200 }
  0x47   :  { %2435 = dma.done.wait [#allocation6], 3072  }
  0x48   :  { %2436 = vsyncadd [#allocation6], 4294964224 }
  0x49   :  { %2437 = dma.done.wait [#allocation9], 1024  }
  0x4a   :  { %2438 = vsyncadd [#allocation9], 4294966272  ;;  %v2115_v0 = vld [vmem:[#allocation7] sm:$0xff]   ;;  %v2116_v1 = vld [vmem:[#allocation7 + $0x8] sm:$0xff]  }
  0x4b   :  { %2010 = vmatprep.subr.bf16.mxu1 %v2115_v0  ;;  %v2117_v2 = vld [vmem:[#allocation7 + $0x10] sm:$0xff]   ;;  %v2118_v3 = vld [vmem:[#allocation7 + $0x18] sm:$0xff]   ;;  %v2123_v4 = vld [vmem:[#allocation5] sm:$0xff]  }
  0x4c   :  { %2011 = vmatpush3.bf16.msra.mxu1 %v2115_v0  ;;  %2026 = vmatprep.mubr.bf16.mxu1 %v2123_v4  ;;  %v2119_v5 = vld [vmem:[#allocation7 + $0x20] sm:$0xff]   ;;  %v2120_v6 = vld [vmem:[#allocation7 + $0x28] sm:$0xff]   ;;  %v2121_v7 = vld [vmem:[#allocation7 + $0x30] sm:$0xff]  }
  0x4d   :  { %2012 = vmatprep.subr.bf16.mxu1 %v2116_v1  ;;  %v2122_v8 = vld [vmem:[#allocation7 + $0x38] sm:$0xff]   ;;  %v2124_v9 = vld [vmem:[#allocation5 + $0x8] sm:$0xff]   ;;  %v2125_v10 = vld [vmem:[#allocation5 + $0x10] sm:$0xff]  }
  0x4e   :  { %v2126_v11 = vld [vmem:[#allocation5 + $0x18] sm:$0xff]   ;;  %v2127_v12 = vld [vmem:[#allocation5 + $0x20] sm:$0xff]   ;;  %v2128_v13 = vld [vmem:[#allocation5 + $0x28] sm:$0xff]  }
  0x4f   :  { %v2129_v14 = vld [vmem:[#allocation5 + $0x30] sm:$0xff]   ;;  %v2130_v15 = vld [vmem:[#allocation5 + $0x38] sm:$0xff]   ;;  %v2131_v16 = vld [vmem:[#allocation5 + $0x40] sm:$0xff]  }
  0x50   :  { %2013 = vmatpush3.bf16.msra.mxu1 %v2116_v1  ;;  %v2132_v17 = vld [vmem:[#allocation5 + $0x48] sm:$0xff]   ;;  %v2133_v18 = vld [vmem:[#allocation5 + $0x50] sm:$0xff]   ;;  %v2134_v19 = vld [vmem:[#allocation5 + $0x58] sm:$0xff]  }
  0x51   :  { %2014 = vmatprep.subr.bf16.mxu1 %v2117_v2  ;;  %v2135_v20 = vld [vmem:[#allocation5 + $0x60] sm:$0xff]   ;;  %v2136_v21 = vld [vmem:[#allocation5 + $0x68] sm:$0xff]   ;;  %v2137_v22 = vld [vmem:[#allocation5 + $0x70] sm:$0xff]  }
  0x52   :  { %v2138_v23 = vld [vmem:[#allocation5 + $0x78] sm:$0xff]   ;;  %v2552_v24 = vld [vmem:[#allocation2 + $0x4] ss:$8 sps:$4 sm:$0xff]  }
  0x54   :  { %2015 = vmatpush3.bf16.msra.mxu1 %v2117_v2 }
  0x55   :  { %2016 = vmatprep.subr.bf16.mxu1 %v2118_v3 }
  0x58   :  { %2017 = vmatpush3.bf16.msra.mxu1 %v2118_v3 }
  0x59   :  { %2018 = vmatprep.subr.bf16.mxu1 %v2119_v5 }
  0x5c   :  { %2019 = vmatpush3.bf16.msra.mxu1 %v2119_v5 }
  0x5d   :  { %2020 = vmatprep.subr.bf16.mxu1 %v2120_v6 }
  0x60   :  { %2021 = vmatpush3.bf16.msra.mxu1 %v2120_v6 }
  0x61   :  { %2022 = vmatprep.subr.bf16.mxu1 %v2121_v7 }
  0x64   :  { %2023 = vmatpush3.bf16.msra.mxu1 %v2121_v7 }
  0x65   :  { %2024 = vmatprep.subr.bf16.mxu1 %v2122_v8 }
  0x68   :  { %2025 = vmatpush3.bf16.msra.mxu1 %v2122_v8 }
  0x6b   :  { %2027 = vmatmul.mubr.bf16.vlgmr.msra.gmra.mrb[0].mxu1 %v2124_v9  ;;  %v2187_v9 = vld [vmem:[#allocation8] sm:$0xff]  }
  0x6c   :  { %2030 = vmatprep.mubr.bf16.mxu1 %v2125_v10  ;;  %v2188_v10 = vld [vmem:[#allocation8 + $0x8] sm:$0xff]   ;;  %2058 = vmatprep.subr.bf16.mxu0 %v2187_v9 }
  0x6d   :  { %2059 = vmatpush3.bf16.msra.mxu0 %v2187_v9 }
  0x6e   :  { %2060 = vmatprep.subr.bf16.mxu0 %v2188_v10 }
  0x71   :  { %2061 = vmatpush3.bf16.msra.mxu0 %v2188_v10 }
  0x73   :  { %2031 = vmatmul.mubr.bf16.gmra.mrb[4].mxu1 %v2126_v11  ;;  %v2555_v11 = vld [vmem:[#allocation2] ss:$8 sps:$4 sm:$0xff]  }
  0x74   :  { %2034 = vmatprep.mubr.bf16.mxu1 %v2127_v12  ;;  %v2189_v12 = vld [vmem:[#allocation8 + $0x10] sm:$0xff]  }
  0x75   :  { %2062 = vmatprep.subr.bf16.mxu0 %v2189_v12 }
  0x76   :  { %2063 = vmatpush3.bf16.msra.mxu0 %v2189_v12 }
  0x7b   :  { %2035 = vmatmul.mubr.bf16.gmra.mrb[8].mxu1 %v2128_v13  ;;  %v2557_v13 = vld [vmem:[#allocation2 + $0x14] ss:$8 sps:$4 sm:$0xff]  }
  0x7c   :  { %2038 = vmatprep.mubr.bf16.mxu1 %v2129_v14  ;;  %v2190_v14 = vld [vmem:[#allocation8 + $0x18] sm:$0xff]  }
  0x7d   :  { %2064 = vmatprep.subr.bf16.mxu0 %v2190_v14 }
  0x7e   :  { %2065 = vmatpush3.bf16.msra.mxu0 %v2190_v14 }
  0x83   :  { %2039 = vmatmul.mubr.bf16.gmra.mrb[12].mxu1 %v2130_v15  ;;  %v2561_v15 = vld [vmem:[#allocation2 + $0x10] ss:$8 sps:$4 sm:$0xff]  }
  0x84   :  { %2042 = vmatprep.mubr.bf16.mxu1 %v2131_v16  ;;  %v2563_v16 = vld [vmem:[#allocation2 + $0x24] ss:$8 sps:$4 sm:$0xff]  }
  0x8b   :  { %2043 = vmatmul.mubr.bf16.gmra.mrb[16].mxu1 %v2132_v17  ;;  %v2567_v17 = vld [vmem:[#allocation2 + $0x20] ss:$8 sps:$4 sm:$0xff]  }
  0x8c   :  { %2046 = vmatprep.mubr.bf16.mxu1 %v2133_v18  ;;  %v2569_v18 = vld [vmem:[#allocation2 + $0x34] ss:$8 sps:$4 sm:$0xff]  }
  0x93   :  { %2047 = vmatmul.mubr.bf16.gmra.mrb[20].mxu1 %v2134_v19  ;;  %v2573_v19 = vld [vmem:[#allocation2 + $0x30] ss:$8 sps:$4 sm:$0xff]  }
  0x94   :  { %2050 = vmatprep.mubr.bf16.mxu1 %v2135_v20  ;;  %v2575_v20 = vld [vmem:[#allocation2 + $0x44] ss:$8 sps:$4 sm:$0xff]  }
  0x9b   :  { %2051 = vmatmul.mubr.bf16.gmra.mrb[24].mxu1 %v2136_v21  ;;  %v2579_v21 = vld [vmem:[#allocation2 + $0x40] ss:$8 sps:$4 sm:$0xff]  }
  0x9c   :  { %2054 = vmatprep.mubr.bf16.mxu1 %v2137_v22  ;;  %v2581_v22 = vld [vmem:[#allocation2 + $0x54] ss:$8 sps:$4 sm:$0xff]  }
  0xa3   :  { %2055 = vmatmul.mubr.bf16.gmra.mrb[28].mxu1 %v2138_v23  ;;  %v2585_v23 = vld [vmem:[#allocation2 + $0x50] ss:$8 sps:$4 sm:$0xff]  }
  0xa4   :  { %680 = vmatprep.mubr.bf16.mxu1 %v2552_v24 }
 0x13e   :  { %v2028_v25 = vpop.f32.mrb[0].mxu1 }
 0x13f   :  { %v338_v26 = vpop.f32.mrb[1].mxu1 }
 0x140   :  { %v2029_v27 = vpop.f32.mrb[2].mxu1 }
 0x141   :  { %v466_v28 = vpack.c.bf16 %v2029_v27, %v2028_v25  ;;  %v341_v29 = vpop.f32.mrb[3].mxu1  ;;  %v2587_v25 = vld [vmem:[#allocation2 + $0x64] ss:$8 sps:$4 sm:$0xff]   ;;  %v2593_v27 = vld [vmem:[#allocation2 + $0x74] ss:$8 sps:$4 sm:$0xff]  }
 0x142   :  { %v465_v30 = vpack.c.bf16 %v341_v29, %v338_v26  ;;  %v2591_v26 = vld [vmem:[#allocation2 + $0x60] ss:$8 sps:$4 sm:$0xff]   ;;  %v2599_v29 = vld [vmem:[#allocation2 + $0x84] ss:$8 sps:$4 sm:$0xff]  }
 0x146   :  { %v2032_v31 = vpop.f32.mrb[4].mxu1 }
 0x147   :  { %v354_v32 = vpop.f32.mrb[5].mxu1 }
 0x148   :  { %v2033_v33 = vpop.f32.mrb[6].mxu1 }
 0x149   :  { %v468_v34 = vpack.c.bf16 %v2033_v33, %v2032_v31  ;;  %v357_v35 = vpop.f32.mrb[7].mxu1  ;;  %v2605_v31 = vld [vmem:[#allocation2 + $0x94] ss:$8 sps:$4 sm:$0xff]   ;;  %v2611_v33 = vld [vmem:[#allocation2 + $0xa4] ss:$8 sps:$4 sm:$0xff]  }
 0x14a   :  { %v467_v36 = vpack.c.bf16 %v357_v35, %v354_v32  ;;  %v2609_v32 = vld [vmem:[#allocation2 + $0x90] ss:$8 sps:$4 sm:$0xff]   ;;  %v2617_v35 = vld [vmem:[#allocation2 + $0xb4] ss:$8 sps:$4 sm:$0xff]  }
 0x14e   :  { %v2036_v37 = vpop.f32.mrb[8].mxu1 }
 0x14f   :  { %v370_v38 = vpop.f32.mrb[9].mxu1 }
 0x150   :  { %v2037_v39 = vpop.f32.mrb[10].mxu1 }
 0x151   :  { %v470_v40 = vpack.c.bf16 %v2037_v39, %v2036_v37  ;;  %v373_v41 = vpop.f32.mrb[11].mxu1  ;;  %v2623_v37 = vld [vmem:[#allocation2 + $0xc4] ss:$8 sps:$4 sm:$0xff]  }
 0x152   :  { %v469_v42 = vpack.c.bf16 %v373_v41, %v370_v38  ;;  %v2191_v38 = vld [vmem:[#allocation8 + $0x20] sm:$0xff]   ;;  %v2192_v39 = vld [vmem:[#allocation8 + $0x28] sm:$0xff]   ;;  %v2629_v41 = vld [vmem:[#allocation2 + $0xd4] ss:$8 sps:$4 sm:$0xff]  }
 0x153   :  { %2066 = vmatprep.subr.bf16.mxu0 %v2191_v38 }
 0x154   :  { %2067 = vmatpush3.bf16.msra.mxu0 %v2191_v38 }
 0x155   :  { %2068 = vmatprep.subr.bf16.mxu0 %v2192_v39 }
 0x156   :  { %v2040_v43 = vpop.f32.mrb[12].mxu1 }
 0x157   :  { %v386_v44 = vpop.f32.mrb[13].mxu1 }
 0x158   :  { %v2041_v45 = vpop.f32.mrb[14].mxu1  ;;  %2069 = vmatpush3.bf16.msra.mxu0 %v2192_v39 }
 0x159   :  { %v472_v46 = vpack.c.bf16 %v2041_v45, %v2040_v43  ;;  %v389_v47 = vpop.f32.mrb[15].mxu1  ;;  %v2194_v43 = vld [vmem:[#allocation8 + $0x38] sm:$0xff]   ;;  %v2635_v45 = vld [vmem:[#allocation2 + $0xe4] ss:$8 sps:$4 sm:$0xff]  }
 0x15a   :  { %v471_v48 = vpack.c.bf16 %v389_v47, %v386_v44  ;;  %v2633_v44 = vld [vmem:[#allocation2 + $0xd0] ss:$8 sps:$4 sm:$0xff]   ;;  %v2641_v47 = vld [vmem:[#allocation2 + $0xf4] ss:$8 sps:$4 sm:$0xff]  }
 0x15e   :  { %v2044_v49 = vpop.f32.mrb[16].mxu1 }
 0x15f   :  { %v402_v50 = vpop.f32.mrb[17].mxu1 }
 0x160   :  { %v2045_v51 = vpop.f32.mrb[18].mxu1 }
 0x161   :  { %v474_v52 = vpack.c.bf16 %v2045_v51, %v2044_v49  ;;  %v405_v53 = vpop.f32.mrb[19].mxu1  ;;  %v2651_v51 = vld [vmem:[%s3095_s3] ss:$0 sm:$0xff] }
 0x162   :  { %v473_v54 = vpack.c.bf16 %v405_v53, %v402_v50 }
 0x164   :  { %1762 = vmatprep.subr.bf16.mxu1 %v473_v54 }
 0x165   :  { %1763 = vmatpush3.bf16.msra.mxu1 %v465_v30  ;;  %v2603_v30 = vld [vmem:[#allocation2 + $0x80] ss:$8 sps:$4 sm:$0xff]  }
 0x166   :  { %v2048_v55 = vpop.f32.mrb[20].mxu1  ;;  %1764 = vmatprep.subr.bf16.mxu1 %v474_v52 }
 0x167   :  { %v418_v56 = vpop.f32.mrb[21].mxu1 }
 0x168   :  { %v2049_v57 = vpop.f32.mrb[22].mxu1 }
 0x169   :  { %v476_v58 = vpack.c.bf16 %v2049_v57, %v2048_v55  ;;  %v421_v59 = vpop.f32.mrb[23].mxu1  ;;  %1765 = vmatpush3.bf16.msra.mxu1 %v466_v28  ;;  %v2597_v28 = vld [vmem:[#allocation2 + $0x70] ss:$8 sps:$4 sm:$0xff]  }
 0x16a   :  { %v475_v60 = vpack.c.bf16 %v421_v59, %v418_v56 }
 0x16c   :  { %1766 = vmatprep.subr.bf16.mxu1 %v475_v60 }
 0x16d   :  { %1767 = vmatpush3.bf16.msra.mxu1 %v467_v36  ;;  %v2621_v36 = vld [vmem:[#allocation2 + $0xb0] ss:$8 sps:$4 sm:$0xff]  }
 0x16e   :  { %v2052_v61 = vpop.f32.mrb[24].mxu1  ;;  %1768 = vmatprep.subr.bf16.mxu1 %v476_v58 }
 0x16f   :  { %v434_v62 = vpop.f32.mrb[25].mxu1 }
 0x170   :  { %v2053_v63 = vpop.f32.mrb[26].mxu1 }
 0x171   :  { %v478_v0 = vpack.c.bf16 %v2053_v63, %v2052_v61  ;;  %v437_v1 = vpop.f32.mrb[27].mxu1  ;;  %1769 = vmatpush3.bf16.msra.mxu1 %v468_v34  ;;  %v2615_v34 = vld [vmem:[#allocation2 + $0xa0] ss:$8 sps:$4 sm:$0xff]  }
 0x172   :  { %v477_v2 = vpack.c.bf16 %v437_v1, %v434_v62 }
 0x174   :  { %1770 = vmatprep.subr.bf16.mxu1 %v477_v2 }
 0x175   :  { %1771 = vmatpush3.bf16.msra.mxu1 %v469_v42  ;;  %v2193_v42 = vld [vmem:[#allocation8 + $0x30] sm:$0xff]  }
 0x176   :  { %v2056_v3 = vpop.f32.mrb[28].mxu1  ;;  %1772 = vmatprep.subr.bf16.mxu1 %v478_v0  ;;  %2070 = vmatprep.subr.bf16.mxu0 %v2193_v42 }
 0x177   :  { %v450_v4 = vpop.f32.mrb[29].mxu1  ;;  %2071 = vmatpush3.bf16.msra.mxu0 %v2193_v42 }
 0x178   :  { %v2057_v5 = vpop.f32.mrb[30].mxu1  ;;  %2072 = vmatprep.subr.bf16.mxu0 %v2194_v43 }
 0x179   :  { %v480_v6 = vpack.c.bf16 %v2057_v5, %v2056_v3  ;;  %v453_v7 = vpop.f32.mrb[31].mxu1  ;;  %1773 = vmatpush3.bf16.msra.mxu1 %v470_v40  ;;  %v2627_v40 = vld [vmem:[#allocation2 + $0xc0] ss:$8 sps:$4 sm:$0xff]  }
 0x17a   :  { %v479_v8 = vpack.c.bf16 %v453_v7, %v450_v4 }
 0x17b   :  { %2073 = vmatpush3.bf16.msra.mxu0 %v2194_v43 }
 0x17c   :  { %1774 = vmatprep.subr.bf16.mxu1 %v479_v8 }
 0x17d   :  { %1775 = vmatpush3.bf16.msra.mxu1 %v471_v48  ;;  %v2645_v48 = vld [vmem:[#allocation2 + $0xf0] ss:$8 sps:$4 sm:$0xff]  }
 0x17e   :  { %1776 = vmatprep.subr.bf16.mxu1 %v480_v6 }
 0x181   :  { %1777 = vmatpush3.bf16.msra.mxu1 %v472_v46  ;;  %v2639_v46 = vld [vmem:[#allocation2 + $0xe0] ss:$8 sps:$4 sm:$0xff]  }
 0x184   :  { %681 = vmatmul.mubr.bf16.vlgmr.msra.gmra.mrb[32].mxu1 %v2555_v11 }
 0x185   :  { %688 = vmatprep.mubr.bf16.mxu1 %v2557_v13 }
 0x18c   :  { %689 = vmatmul.mubr.bf16.gmra.mrb[36].mxu1 %v2561_v15 }
 0x18d   :  { %696 = vmatprep.mubr.bf16.mxu1 %v2563_v16 }
 0x194   :  { %697 = vmatmul.mubr.bf16.gmra.mrb[40].mxu1 %v2567_v17 }
 0x195   :  { %704 = vmatprep.mubr.bf16.mxu1 %v2569_v18 }
 0x19c   :  { %705 = vmatmul.mubr.bf16.gmra.mrb[44].mxu1 %v2573_v19 }
 0x19d   :  { %712 = vmatprep.mubr.bf16.mxu1 %v2575_v20 }
 0x1a4   :  { %713 = vmatmul.mubr.bf16.gmra.mrb[48].mxu1 %v2579_v21 }
 0x1a5   :  { %720 = vmatprep.mubr.bf16.mxu1 %v2581_v22 }
 0x1ac   :  { %721 = vmatmul.mubr.bf16.gmra.mrb[52].mxu1 %v2585_v23 }
 0x1ad   :  { %728 = vmatprep.mubr.bf16.mxu1 %v2587_v25 }
 0x1b4   :  { %729 = vmatmul.mubr.bf16.gmra.mrb[56].mxu1 %v2591_v26 }
 0x1b5   :  { %736 = vmatprep.mubr.bf16.mxu1 %v2593_v27 }
 0x1bc   :  { %737 = vmatmul.mubr.bf16.gmra.mrb[60].mxu1 %v2597_v28 }
 0x1bd   :  { %744 = vmatprep.mubr.bf16.mxu1 %v2599_v29 }
 0x1c4   :  { %745 = vmatmul.mubr.bf16.gmra.mrb[64].mxu1 %v2603_v30 }
 0x1c5   :  { %752 = vmatprep.mubr.bf16.mxu1 %v2605_v31 }
 0x1cc   :  { %753 = vmatmul.mubr.bf16.gmra.mrb[68].mxu1 %v2609_v32 }
 0x1cd   :  { %760 = vmatprep.mubr.bf16.mxu1 %v2611_v33 }
 0x1d4   :  { %761 = vmatmul.mubr.bf16.gmra.mrb[72].mxu1 %v2615_v34 }
 0x1d5   :  { %768 = vmatprep.mubr.bf16.mxu1 %v2617_v35 }
 0x1dc   :  { %769 = vmatmul.mubr.bf16.gmra.mrb[76].mxu1 %v2621_v36 }
 0x1dd   :  { %776 = vmatprep.mubr.bf16.mxu1 %v2623_v37 }
 0x1e4   :  { %777 = vmatmul.mubr.bf16.gmra.mrb[80].mxu1 %v2627_v40 }
 0x1e5   :  { %784 = vmatprep.mubr.bf16.mxu1 %v2629_v41 }
 0x1ec   :  { %785 = vmatmul.mubr.bf16.gmra.mrb[84].mxu1 %v2633_v44 }
 0x1ed   :  { %792 = vmatprep.mubr.bf16.mxu1 %v2635_v45 }
 0x1f4   :  { %793 = vmatmul.mubr.bf16.gmra.mrb[88].mxu1 %v2639_v46 }
 0x1f5   :  { %800 = vmatprep.mubr.bf16.mxu1 %v2641_v47 }
 0x1fc   :  { %801 = vmatmul.mubr.bf16.gmra.mrb[92].mxu1 %v2645_v48 }
 0x257   :  { %v1778_v49 = vpop.f32.mrb[32].mxu1 }
 0x258   :  { %v1779_v50 = vpop.f32.mrb[33].mxu1 }
 0x259   :  { %v1780_v52 = vadd.f32 %v1779_v50, %v1778_v49  ;;  %v1781_v53 = vpop.f32.mrb[34].mxu1 }
 0x25a   :  { %v1782_v54 = vpop.f32.mrb[35].mxu1 }
 0x25b   :  { %v1783_v55 = vadd.f32 %v1782_v54, %v1781_v53  ;;  %v683_v56 = vadd.f32 %v1780_v52, %v2651_v51 }
 0x25d   :  { %v686_v57 = vadd.f32 %v1783_v55, %v2651_v51  ;;  %v809_v59 = vmax.f32 %v683_v56, 0.0 }
 0x25f   :  { %v1784_v58 = vpop.f32.mrb[36].mxu1  ;;  %v810_v60 = vmax.f32 %v686_v57, 0.0 }
 0x260   :  { %v1785_v61 = vpop.f32.mrb[37].mxu1 }
 0x261   :  { %v1786_v62 = vadd.f32 %v1785_v61, %v1784_v58  ;;  %v1787_v63 = vpop.f32.mrb[38].mxu1  ;;  %v841_v0 = vpack.c.bf16 %v810_v60, %v809_v59 }
 0x262   :  { %v1788_v1 = vpop.f32.mrb[39].mxu1 }
 0x263   :  { %v691_v2 = vadd.f32 %v1786_v62, %v2651_v51  ;;  %v1789_v3 = vadd.f32 %v1788_v1, %v1787_v63  ;;  %2074 = vmatprep.mubr.bf16.mxu0 %v841_v0 }
 0x265   :  { %v694_v4 = vadd.f32 %v1789_v3, %v2651_v51  ;;  %v811_v5 = vmax.f32 %v691_v2, 0.0 }
 0x267   :  { %v812_v6 = vmax.f32 %v694_v4, 0.0  ;;  %v1790_v7 = vpop.f32.mrb[40].mxu1 }
 0x268   :  { %v1791_v8 = vpop.f32.mrb[41].mxu1 }
 0x269   :  { %v1792_v9 = vadd.f32 %v1791_v8, %v1790_v7  ;;  %v842_v10 = vpack.c.bf16 %v812_v6, %v811_v5  ;;  %v1793_v12 = vpop.f32.mrb[42].mxu1 }
 0x26a   :  { %v1794_v14 = vpop.f32.mrb[43].mxu1 }
 0x26b   :  { %v699_v38 = vadd.f32 %v1792_v9, %v2651_v51  ;;  %2075 = vmatmul.mubr.bf16.vlgmr.msra.gmra.mrb[0].mxu0 %v842_v10  ;;  %v1795_v39 = vadd.f32 %v1794_v14, %v1793_v12 }
 0x26d   :  { %v702_v42 = vadd.f32 %v1795_v39, %v2651_v51  ;;  %v813_v43 = vmax.f32 %v699_v38, 0.0 }
 0x26f   :  { %v814_v49 = vmax.f32 %v702_v42, 0.0  ;;  %v1796_v50 = vpop.f32.mrb[44].mxu1 }
 0x270   :  { %v1797_v52 = vpop.f32.mrb[45].mxu1 }
 0x271   :  { %v1798_v53 = vadd.f32 %v1797_v52, %v1796_v50  ;;  %v1799_v54 = vpop.f32.mrb[46].mxu1  ;;  %v843_v55 = vpack.c.bf16 %v814_v49, %v813_v43 }
 0x272   :  { %v1800_v56 = vpop.f32.mrb[47].mxu1 }
 0x273   :  { %v707_v57 = vadd.f32 %v1798_v53, %v2651_v51  ;;  %v1801_v58 = vadd.f32 %v1800_v56, %v1799_v54  ;;  %2078 = vmatprep.mubr.bf16.mxu0 %v843_v55 }
 0x275   :  { %v710_v59 = vadd.f32 %v1801_v58, %v2651_v51  ;;  %v815_v60 = vmax.f32 %v707_v57, 0.0 }
 0x277   :  { %v816_v61 = vmax.f32 %v710_v59, 0.0  ;;  %v1802_v62 = vpop.f32.mrb[48].mxu1 }
 0x278   :  { %v1803_v63 = vpop.f32.mrb[49].mxu1 }
 0x279   :  { %v1804_v0 = vadd.f32 %v1803_v63, %v1802_v62  ;;  %v1805_v1 = vpop.f32.mrb[50].mxu1  ;;  %v844_v2 = vpack.c.bf16 %v816_v61, %v815_v60 }
 0x27a   :  { %v1806_v3 = vpop.f32.mrb[51].mxu1 }
 0x27b   :  { %v715_v4 = vadd.f32 %v1804_v0, %v2651_v51  ;;  %2079 = vmatmul.mubr.bf16.gmra.mrb[4].mxu0 %v844_v2  ;;  %v1807_v5 = vadd.f32 %v1806_v3, %v1805_v1 }
 0x27d   :  { %v718_v6 = vadd.f32 %v1807_v5, %v2651_v51  ;;  %v817_v7 = vmax.f32 %v715_v4, 0.0 }
 0x27f   :  { %v818_v8 = vmax.f32 %v718_v6, 0.0  ;;  %v1808_v9 = vpop.f32.mrb[52].mxu1 }
 0x280   :  { %v1809_v10 = vpop.f32.mrb[53].mxu1 }
 0x281   :  { %v1810_v12 = vadd.f32 %v1809_v10, %v1808_v9  ;;  %v1811_v14 = vpop.f32.mrb[54].mxu1  ;;  %v845_v38 = vpack.c.bf16 %v818_v8, %v817_v7 }
 0x282   :  { %v1812_v39 = vpop.f32.mrb[55].mxu1 }
 0x283   :  { %v723_v42 = vadd.f32 %v1810_v12, %v2651_v51  ;;  %v1813_v43 = vadd.f32 %v1812_v39, %v1811_v14  ;;  %2082 = vmatprep.mubr.bf16.mxu0 %v845_v38 }
 0x285   :  { %v726_v49 = vadd.f32 %v1813_v43, %v2651_v51  ;;  %v819_v50 = vmax.f32 %v723_v42, 0.0 }
 0x287   :  { %v820_v52 = vmax.f32 %v726_v49, 0.0  ;;  %v1814_v53 = vpop.f32.mrb[56].mxu1 }
 0x288   :  { %v1815_v54 = vpop.f32.mrb[57].mxu1 }
 0x289   :  { %v1816_v55 = vadd.f32 %v1815_v54, %v1814_v53  ;;  %v1817_v56 = vpop.f32.mrb[58].mxu1  ;;  %v846_v57 = vpack.c.bf16 %v820_v52, %v819_v50 }
 0x28a   :  { %v1818_v58 = vpop.f32.mrb[59].mxu1 }
 0x28b   :  { %v731_v59 = vadd.f32 %v1816_v55, %v2651_v51  ;;  %v1819_v60 = vadd.f32 %v1818_v58, %v1817_v56  ;;  %2083 = vmatmul.mubr.bf16.gmra.mrb[8].mxu0 %v846_v57 }
 0x28d   :  { %v734_v61 = vadd.f32 %v1819_v60, %v2651_v51  ;;  %v821_v62 = vmax.f32 %v731_v59, 0.0 }
 0x28f   :  { %v822_v63 = vmax.f32 %v734_v61, 0.0  ;;  %v1820_v0 = vpop.f32.mrb[60].mxu1 }
 0x290   :  { %v1821_v1 = vpop.f32.mrb[61].mxu1 }
 0x291   :  { %v1822_v2 = vadd.f32 %v1821_v1, %v1820_v0  ;;  %v1823_v3 = vpop.f32.mrb[62].mxu1  ;;  %v847_v4 = vpack.c.bf16 %v822_v63, %v821_v62 }
 0x292   :  { %v1824_v5 = vpop.f32.mrb[63].mxu1 }
 0x293   :  { %v739_v6 = vadd.f32 %v1822_v2, %v2651_v51  ;;  %v1825_v7 = vadd.f32 %v1824_v5, %v1823_v3  ;;  %2086 = vmatprep.mubr.bf16.mxu0 %v847_v4 }
 0x295   :  { %v742_v8 = vadd.f32 %v1825_v7, %v2651_v51  ;;  %v823_v9 = vmax.f32 %v739_v6, 0.0 }
 0x297   :  { %v824_v10 = vmax.f32 %v742_v8, 0.0  ;;  %v1826_v12 = vpop.f32.mrb[64].mxu1 }
 0x298   :  { %v1827_v14 = vpop.f32.mrb[65].mxu1 }
 0x299   :  { %v1828_v38 = vadd.f32 %v1827_v14, %v1826_v12  ;;  %v1829_v39 = vpop.f32.mrb[66].mxu1  ;;  %v848_v42 = vpack.c.bf16 %v824_v10, %v823_v9 }
 0x29a   :  { %v1830_v43 = vpop.f32.mrb[67].mxu1 }
 0x29b   :  { %v747_v49 = vadd.f32 %v1828_v38, %v2651_v51  ;;  %v1831_v50 = vadd.f32 %v1830_v43, %v1829_v39  ;;  %2087 = vmatmul.mubr.bf16.gmra.mrb[12].mxu0 %v848_v42 }
 0x29d   :  { %v750_v52 = vadd.f32 %v1831_v50, %v2651_v51  ;;  %v825_v53 = vmax.f32 %v747_v49, 0.0 }
 0x29f   :  { %v826_v54 = vmax.f32 %v750_v52, 0.0  ;;  %v1832_v55 = vpop.f32.mrb[68].mxu1 }
 0x2a0   :  { %v1833_v56 = vpop.f32.mrb[69].mxu1 }
 0x2a1   :  { %v1834_v57 = vadd.f32 %v1833_v56, %v1832_v55  ;;  %v1835_v58 = vpop.f32.mrb[70].mxu1  ;;  %v849_v59 = vpack.c.bf16 %v826_v54, %v825_v53 }
 0x2a2   :  { %v1836_v60 = vpop.f32.mrb[71].mxu1 }
 0x2a3   :  { %v755_v61 = vadd.f32 %v1834_v57, %v2651_v51  ;;  %v1837_v62 = vadd.f32 %v1836_v60, %v1835_v58  ;;  %2090 = vmatprep.mubr.bf16.mxu0 %v849_v59 }
 0x2a5   :  { %v758_v63 = vadd.f32 %v1837_v62, %v2651_v51  ;;  %v827_v0 = vmax.f32 %v755_v61, 0.0 }
 0x2a7   :  { %v828_v1 = vmax.f32 %v758_v63, 0.0  ;;  %v1838_v2 = vpop.f32.mrb[72].mxu1 }
 0x2a8   :  { %v1839_v3 = vpop.f32.mrb[73].mxu1 }
 0x2a9   :  { %v850_v4 = vpack.c.bf16 %v828_v1, %v827_v0  ;;  %v1840_v5 = vadd.f32 %v1839_v3, %v1838_v2  ;;  %v1841_v6 = vpop.f32.mrb[74].mxu1 }
 0x2aa   :  { %v1842_v7 = vpop.f32.mrb[75].mxu1 }
 0x2ab   :  { %2091 = vmatmul.mubr.bf16.gmra.mrb[16].mxu0 %v850_v4  ;;  %v763_v8 = vadd.f32 %v1840_v5, %v2651_v51  ;;  %v1843_v9 = vadd.f32 %v1842_v7, %v1841_v6 }
 0x2ad   :  { %v766_v10 = vadd.f32 %v1843_v9, %v2651_v51  ;;  %v829_v12 = vmax.f32 %v763_v8, 0.0 }
 0x2af   :  { %v830_v14 = vmax.f32 %v766_v10, 0.0  ;;  %v1844_v38 = vpop.f32.mrb[76].mxu1 }
 0x2b0   :  { %v1845_v39 = vpop.f32.mrb[77].mxu1 }
 0x2b1   :  { %v1846_v42 = vadd.f32 %v1845_v39, %v1844_v38  ;;  %v1847_v43 = vpop.f32.mrb[78].mxu1  ;;  %v851_v49 = vpack.c.bf16 %v830_v14, %v829_v12 }
 0x2b2   :  { %v1848_v50 = vpop.f32.mrb[79].mxu1 }
 0x2b3   :  { %v771_v52 = vadd.f32 %v1846_v42, %v2651_v51  ;;  %v1849_v53 = vadd.f32 %v1848_v50, %v1847_v43  ;;  %2094 = vmatprep.mubr.bf16.mxu0 %v851_v49 }
 0x2b5   :  { %v774_v54 = vadd.f32 %v1849_v53, %v2651_v51  ;;  %v831_v55 = vmax.f32 %v771_v52, 0.0 }
 0x2b7   :  { %v832_v56 = vmax.f32 %v774_v54, 0.0  ;;  %v1850_v57 = vpop.f32.mrb[80].mxu1 }
 0x2b8   :  { %v1851_v58 = vpop.f32.mrb[81].mxu1 }
 0x2b9   :  { %v852_v59 = vpack.c.bf16 %v832_v56, %v831_v55  ;;  %v1852_v60 = vadd.f32 %v1851_v58, %v1850_v57  ;;  %v1853_v61 = vpop.f32.mrb[82].mxu1 }
 0x2ba   :  { %v1854_v62 = vpop.f32.mrb[83].mxu1 }
 0x2bb   :  { %2095 = vmatmul.mubr.bf16.gmra.mrb[20].mxu0 %v852_v59  ;;  %v779_v63 = vadd.f32 %v1852_v60, %v2651_v51  ;;  %v1855_v0 = vadd.f32 %v1854_v62, %v1853_v61 }
 0x2bd   :  { %v782_v1 = vadd.f32 %v1855_v0, %v2651_v51  ;;  %v833_v2 = vmax.f32 %v779_v63, 0.0 }
 0x2bf   :  { %v834_v3 = vmax.f32 %v782_v1, 0.0  ;;  %v1856_v4 = vpop.f32.mrb[84].mxu1 }
 0x2c0   :  { %v1857_v5 = vpop.f32.mrb[85].mxu1 }
 0x2c1   :  { %v1858_v6 = vadd.f32 %v1857_v5, %v1856_v4  ;;  %v1859_v7 = vpop.f32.mrb[86].mxu1  ;;  %v853_v8 = vpack.c.bf16 %v834_v3, %v833_v2 }
 0x2c2   :  { %v1860_v9 = vpop.f32.mrb[87].mxu1 }
 0x2c3   :  { %v787_v10 = vadd.f32 %v1858_v6, %v2651_v51  ;;  %v1861_v12 = vadd.f32 %v1860_v9, %v1859_v7  ;;  %2098 = vmatprep.mubr.bf16.mxu0 %v853_v8 }
 0x2c5   :  { %v790_v14 = vadd.f32 %v1861_v12, %v2651_v51  ;;  %v835_v38 = vmax.f32 %v787_v10, 0.0 }
 0x2c7   :  { %v836_v39 = vmax.f32 %v790_v14, 0.0  ;;  %v1862_v42 = vpop.f32.mrb[88].mxu1 }
 0x2c8   :  { %v1863_v43 = vpop.f32.mrb[89].mxu1 }
 0x2c9   :  { %v854_v49 = vpack.c.bf16 %v836_v39, %v835_v38  ;;  %v1864_v50 = vadd.f32 %v1863_v43, %v1862_v42  ;;  %v1865_v52 = vpop.f32.mrb[90].mxu1 }
 0x2ca   :  { %v1866_v53 = vpop.f32.mrb[91].mxu1 }
 0x2cb   :  { %2099 = vmatmul.mubr.bf16.gmra.mrb[24].mxu0 %v854_v49  ;;  %v795_v54 = vadd.f32 %v1864_v50, %v2651_v51  ;;  %v1867_v55 = vadd.f32 %v1866_v53, %v1865_v52 }
 0x2cd   :  { %v798_v56 = vadd.f32 %v1867_v55, %v2651_v51  ;;  %v837_v57 = vmax.f32 %v795_v54, 0.0 }
 0x2cf   :  { %v838_v58 = vmax.f32 %v798_v56, 0.0  ;;  %v1868_v59 = vpop.f32.mrb[92].mxu1 }
 0x2d0   :  { %v1869_v60 = vpop.f32.mrb[93].mxu1 }
 0x2d1   :  { %v1870_v61 = vadd.f32 %v1869_v60, %v1868_v59  ;;  %v1871_v62 = vpop.f32.mrb[94].mxu1  ;;  %v855_v63 = vpack.c.bf16 %v838_v58, %v837_v57 }
 0x2d2   :  { %v1872_v0 = vpop.f32.mrb[95].mxu1 }
 0x2d3   :  { %v803_v1 = vadd.f32 %v1870_v61, %v2651_v51  ;;  %v1873_v2 = vadd.f32 %v1872_v0, %v1871_v62  ;;  %2102 = vmatprep.mubr.bf16.mxu0 %v855_v63 }
 0x2d5   :  { %v806_v3 = vadd.f32 %v1873_v2, %v2651_v51  ;;  %v839_v4 = vmax.f32 %v803_v1, 0.0 }
 0x2d7   :  { %v840_v5 = vmax.f32 %v806_v3, 0.0 }
 0x2d9   :  { %v856_v6 = vpack.c.bf16 %v840_v5, %v839_v4 }
 0x2db   :  { %2103 = vmatmul.mubr.bf16.gmra.mrb[28].mxu0 %v856_v6 }
 0x2dc   :  { %1137 = vmatprep.mubr.bf16.mxu0 %v2552_v24 }
 0x33e   :  { %v2076_v7 = vpop.f32.mrb[0].mxu0 }
 0x33f   :  { %v955_v8 = vpop.f32.mrb[1].mxu0 }
 0x340   :  { %v2077_v9 = vpop.f32.mrb[2].mxu0 }
 0x341   :  { %v1083_v10 = vpack.c.bf16 %v2077_v9, %v2076_v7  ;;  %v958_v12 = vpop.f32.mrb[3].mxu0 }
 0x342   :  { %v1082_v14 = vpack.c.bf16 %v958_v12, %v955_v8 }
 0x34e   :  { %v2080_v38 = vpop.f32.mrb[4].mxu0 }
 0x34f   :  { %v971_v39 = vpop.f32.mrb[5].mxu0 }
 0x350   :  { %v2081_v42 = vpop.f32.mrb[6].mxu0 }
 0x351   :  { %v1085_v43 = vpack.c.bf16 %v2081_v42, %v2080_v38  ;;  %v974_v49 = vpop.f32.mrb[7].mxu0 }
 0x352   :  { %v1084_v50 = vpack.c.bf16 %v974_v49, %v971_v39 }
 0x35e   :  { %v2084_v52 = vpop.f32.mrb[8].mxu0 }
 0x35f   :  { %v987_v51 = vpop.f32.mrb[9].mxu0 }
 0x360   :  { %v2085_v53 = vpop.f32.mrb[10].mxu0 }
 0x361   :  { %v1087_v54 = vpack.c.bf16 %v2085_v53, %v2084_v52  ;;  %v990_v55 = vpop.f32.mrb[11].mxu0 }
 0x362   :  { %v1086_v56 = vpack.c.bf16 %v990_v55, %v987_v51 }
 0x36e   :  { %v2088_v57 = vpop.f32.mrb[12].mxu0 }
 0x36f   :  { %v1003_v24 = vpop.f32.mrb[13].mxu0 }
 0x370   :  { %v2089_v58 = vpop.f32.mrb[14].mxu0 }
 0x371   :  { %v1089_v59 = vpack.c.bf16 %v2089_v58, %v2088_v57  ;;  %v1006_v60 = vpop.f32.mrb[15].mxu0 }
 0x372   :  { %v1088_v61 = vpack.c.bf16 %v1006_v60, %v1003_v24 }
 0x37e   :  { %v2092_v62 = vpop.f32.mrb[16].mxu0 }
 0x37f   :  { %v1019_v63 = vpop.f32.mrb[17].mxu0 }
 0x380   :  { %v2093_v0 = vpop.f32.mrb[18].mxu0 }
 0x381   :  { %v1091_v1 = vpack.c.bf16 %v2093_v0, %v2092_v62  ;;  %v1022_v2 = vpop.f32.mrb[19].mxu0 }
 0x382   :  { %v1090_v3 = vpack.c.bf16 %v1022_v2, %v1019_v63 }
 0x384   :  { %1898 = vmatprep.subr.bf16.mxu0 %v1090_v3 }
 0x385   :  { %1899 = vmatpush3.bf16.msra.mxu0 %v1082_v14 }
 0x386   :  { %1900 = vmatprep.subr.bf16.mxu0 %v1091_v1 }
 0x389   :  { %1901 = vmatpush3.bf16.msra.mxu0 %v1083_v10 }
 0x38e   :  { %v2096_v4 = vpop.f32.mrb[20].mxu0 }
 0x38f   :  { %v1035_v5 = vpop.f32.mrb[21].mxu0 }
 0x390   :  { %v2097_v6 = vpop.f32.mrb[22].mxu0 }
 0x391   :  { %v1093_v7 = vpack.c.bf16 %v2097_v6, %v2096_v4  ;;  %v1038_v8 = vpop.f32.mrb[23].mxu0 }
 0x392   :  { %v1092_v9 = vpack.c.bf16 %v1038_v8, %v1035_v5 }
 0x394   :  { %1902 = vmatprep.subr.bf16.mxu0 %v1092_v9 }
 0x395   :  { %1903 = vmatpush3.bf16.msra.mxu0 %v1084_v50 }
 0x396   :  { %1904 = vmatprep.subr.bf16.mxu0 %v1093_v7 }
 0x399   :  { %1905 = vmatpush3.bf16.msra.mxu0 %v1085_v43 }
 0x39e   :  { %v2100_v12 = vpop.f32.mrb[24].mxu0 }
 0x39f   :  { %v1051_v38 = vpop.f32.mrb[25].mxu0 }
 0x3a0   :  { %v2101_v39 = vpop.f32.mrb[26].mxu0 }
 0x3a1   :  { %v1095_v42 = vpack.c.bf16 %v2101_v39, %v2100_v12  ;;  %v1054_v49 = vpop.f32.mrb[27].mxu0 }
 0x3a2   :  { %v1094_v52 = vpack.c.bf16 %v1054_v49, %v1051_v38 }
 0x3a4   :  { %1906 = vmatprep.subr.bf16.mxu0 %v1094_v52 }
 0x3a5   :  { %1907 = vmatpush3.bf16.msra.mxu0 %v1086_v56 }
 0x3a6   :  { %1908 = vmatprep.subr.bf16.mxu0 %v1095_v42 }
 0x3a9   :  { %1909 = vmatpush3.bf16.msra.mxu0 %v1087_v54 }
 0x3ae   :  { %v2104_v10 = vpop.f32.mrb[28].mxu0 }
 0x3af   :  { %v1067_v14 = vpop.f32.mrb[29].mxu0 }
 0x3b0   :  { %v2105_v51 = vpop.f32.mrb[30].mxu0 }
 0x3b1   :  { %v1097_v53 = vpack.c.bf16 %v2105_v51, %v2104_v10  ;;  %v1070_v55 = vpop.f32.mrb[31].mxu0 }
 0x3b2   :  { %v1096_v57 = vpack.c.bf16 %v1070_v55, %v1067_v14 }
 0x3b4   :  { %1910 = vmatprep.subr.bf16.mxu0 %v1096_v57 }
 0x3b5   :  { %1911 = vmatpush3.bf16.msra.mxu0 %v1088_v61 }
 0x3b6   :  { %1912 = vmatprep.subr.bf16.mxu0 %v1097_v53 }
 0x3b9   :  { %1913 = vmatpush3.bf16.msra.mxu0 %v1089_v59 }
 0x3bc   :  { %1138 = vmatmul.mubr.bf16.vlgmr.msra.gmra.mrb[32].mxu0 %v2555_v11  ;;  %v1266_v11 = vlaneseq }
 0x3bd   :  { %1145 = vmatprep.mubr.bf16.mxu0 %v2557_v13 }
 0x3be   :  { %v2717_v13 = vand.u32 127, %v1266_v11 }
 0x3c0   :  { %vm1268_vm0 = vcmp.lt.s32.totalorder %v2717_v13, 7 }
 0x3c4   :  { %1146 = vmatmul.mubr.bf16.gmra.mrb[36].mxu0 %v2561_v15 }
 0x3c5   :  { %1153 = vmatprep.mubr.bf16.mxu0 %v2563_v16 }
 0x3cc   :  { %1154 = vmatmul.mubr.bf16.gmra.mrb[40].mxu0 %v2567_v17  ;;  %v2722_v17 = vld [vmem:[%s3097_s5] ss:$0 sm:$0xff]  ;;  %s2449_s5 = smov [#allocation10]  }
 0x3cd   :  { %1161 = vmatprep.mubr.bf16.mxu0 %v2569_v18  ;;  %s1658_s25 = sshll.u32 %s2449_s5, 4  ;;  %s1659_s25 = int_to_ptr.vmem [resolvable:$true] %s1658_s25 }
 0x3ce   :  { %s2411_s26 = scalar_lea.vmem %s1659_s25, 4096  ;;  %p2416_p5 = scmp.lt.s32.totalorder %s1659_s25, %s1659_s25 }
 0x3cf   :  { %p2412_p4 = scmp.ne.s32.totalorder %s1659_s25, %s2411_s26  ;;  %p2417_p6 = scmp.lt.s32.totalorder %s2411_s26, %s2411_s26 }
 0x3d1   :  { %p2418_p7 = por %p2417_p6, %p2416_p5 }
 0x3d3   :  { %p2419_p8 = pnand %p2418_p7, %p2412_p4 }
 0x3d4   :  { %1162 = vmatmul.mubr.bf16.gmra.mrb[44].mxu0 %v2573_v19 }
 0x3d5   :  { %1169 = vmatprep.mubr.bf16.mxu0 %v2575_v20 }
 0x3dc   :  { %1170 = vmatmul.mubr.bf16.gmra.mrb[48].mxu0 %v2579_v21 }
 0x3dd   :  { %1177 = vmatprep.mubr.bf16.mxu0 %v2581_v22 }
 0x3e4   :  { %1178 = vmatmul.mubr.bf16.gmra.mrb[52].mxu0 %v2585_v23 }
 0x3e5   :  { %1185 = vmatprep.mubr.bf16.mxu0 %v2587_v25 }
 0x3ec   :  { %1186 = vmatmul.mubr.bf16.gmra.mrb[56].mxu0 %v2591_v26 }
 0x3ed   :  { %1193 = vmatprep.mubr.bf16.mxu0 %v2593_v27 }
 0x3f4   :  { %1194 = vmatmul.mubr.bf16.gmra.mrb[60].mxu0 %v2597_v28 }
 0x3f5   :  { %1201 = vmatprep.mubr.bf16.mxu0 %v2599_v29 }
 0x3fc   :  { %1202 = vmatmul.mubr.bf16.gmra.mrb[64].mxu0 %v2603_v30 }
 0x3fd   :  { %1209 = vmatprep.mubr.bf16.mxu0 %v2605_v31 }
 0x404   :  { %1210 = vmatmul.mubr.bf16.gmra.mrb[68].mxu0 %v2609_v32 }
 0x405   :  { %1217 = vmatprep.mubr.bf16.mxu0 %v2611_v33 }
 0x40c   :  { %1218 = vmatmul.mubr.bf16.gmra.mrb[72].mxu0 %v2615_v34 }
 0x40d   :  { %1225 = vmatprep.mubr.bf16.mxu0 %v2617_v35 }
 0x414   :  { %1226 = vmatmul.mubr.bf16.gmra.mrb[76].mxu0 %v2621_v36 }
 0x415   :  { %1233 = vmatprep.mubr.bf16.mxu0 %v2623_v37 }
 0x41c   :  { %1234 = vmatmul.mubr.bf16.gmra.mrb[80].mxu0 %v2627_v40 }
 0x41d   :  { %1241 = vmatprep.mubr.bf16.mxu0 %v2629_v41 }
 0x424   :  { %1242 = vmatmul.mubr.bf16.gmra.mrb[84].mxu0 %v2633_v44 }
 0x425   :  { %1249 = vmatprep.mubr.bf16.mxu0 %v2635_v45 }
 0x42c   :  { %1250 = vmatmul.mubr.bf16.gmra.mrb[88].mxu0 %v2639_v46 }
 0x42d   :  { %1257 = vmatprep.mubr.bf16.mxu0 %v2641_v47 }
 0x434   :  { %1258 = vmatmul.mubr.bf16.gmra.mrb[92].mxu0 %v2645_v48 }
 0x48f   :  { %v1914_v15 = vpop.f32.mrb[32].mxu0 }
 0x490   :  { %v1915_v16 = vpop.f32.mrb[33].mxu0 }
 0x491   :  { %v1916_v18 = vadd.f32 %v1915_v16, %v1914_v15  ;;  %v1917_v19 = vpop.f32.mrb[34].mxu0 }
 0x492   :  { %v1918_v20 = vpop.f32.mrb[35].mxu0 }
 0x493   :  { %v1919_v21 = vadd.f32 %v1918_v20, %v1917_v19  ;;  %v1140_v22 = vadd.f32 %v1916_v18, %v2722_v17 }
 0x495   :  { %v2728_v23 = vsel %vm1268_vm0, %v1140_v22, -1e+30  ;;  %v1143_v25 = vadd.f32 %v1919_v21, %v2722_v17 }
 0x496   :  { %1301 = vmax.xlane.f32.xlu0 %v2728_v23 }
 0x497   :  { %v1920_v26 = vpop.f32.mrb[36].mxu0  ;;  %v2734_v29 = vsel %vm1268_vm0, %v1143_v25, -1e+30 }
 0x498   :  { %v1921_v27 = vpop.f32.mrb[37].mxu0 }
 0x499   :  { %v1922_v28 = vadd.f32 %v1921_v27, %v1920_v26  ;;  %v1923_v30 = vpop.f32.mrb[38].mxu0 }
 0x49a   :  { %1303 = vmax.xlane.f32.xlu0 %v2734_v29  ;;  %v1924_v31 = vpop.f32.mrb[39].mxu0 }
 0x49b   :  { %v1925_v32 = vadd.f32 %v1924_v31, %v1923_v30  ;;  %v1148_v33 = vadd.f32 %v1922_v28, %v2722_v17 }
 0x49d   :  { %v2740_v34 = vsel %vm1268_vm0, %v1148_v33, -1e+30  ;;  %v1151_v35 = vadd.f32 %v1925_v32, %v2722_v17 }
 0x49e   :  { %1305 = vmax.xlane.f32.xlu1 %v2740_v34 }
 0x49f   :  { %v1926_v36 = vpop.f32.mrb[40].mxu0  ;;  %v2746_v44 = vsel %vm1268_vm0, %v1151_v35, -1e+30 }
 0x4a0   :  { %v1927_v37 = vpop.f32.mrb[41].mxu0 }
 0x4a1   :  { %v1928_v40 = vadd.f32 %v1927_v37, %v1926_v36  ;;  %v1929_v41 = vpop.f32.mrb[42].mxu0 }
 0x4a2   :  { %v1930_v45 = vpop.f32.mrb[43].mxu0  ;;  %1307 = vmax.xlane.f32.xlu1 %v2746_v44 }
 0x4a3   :  { %v1931_v46 = vadd.f32 %v1930_v45, %v1929_v41  ;;  %v1156_v47 = vadd.f32 %v1928_v40, %v2722_v17 }
 0x4a5   :  { %v2752_v48 = vsel %vm1268_vm0, %v1156_v47, -1e+30  ;;  %v1159_v43 = vadd.f32 %v1931_v46, %v2722_v17 }
 0x4a6   :  { %1309 = vmax.xlane.f32.xlu0 %v2752_v48 }
 0x4a7   :  { %v1932_v50 = vpop.f32.mrb[44].mxu0  ;;  %v2758_v54 = vsel %vm1268_vm0, %v1159_v43, -1e+30 }
 0x4a8   :  { %v1933_v56 = vpop.f32.mrb[45].mxu0  ;;  %1311 = vmax.xlane.f32.xlu1 %v2758_v54 }
 0x4a9   :  { %v1934_v24 = vadd.f32 %v1933_v56, %v1932_v50  ;;  %v1935_v58 = vpop.f32.mrb[46].mxu0 }
 0x4aa   :  { %v1936_v59 = vpop.f32.mrb[47].mxu0 }
 0x4ab   :  { %v1937_v60 = vadd.f32 %v1936_v59, %v1935_v58  ;;  %v1164_v61 = vadd.f32 %v1934_v24, %v2722_v17 }
 0x4ad   :  { %v2764_v62 = vsel %vm1268_vm0, %v1164_v61, -1e+30  ;;  %v1167_v63 = vadd.f32 %v1937_v60, %v2722_v17 }
 0x4ae   :  { %1313 = vmax.xlane.f32.xlu0 %v2764_v62 }
 0x4af   :  { %v1938_v0 = vpop.f32.mrb[48].mxu0  ;;  %v2770_v1 = vsel %vm1268_vm0, %v1167_v63, -1e+30 }
 0x4b0   :  { %v1939_v2 = vpop.f32.mrb[49].mxu0  ;;  %1315 = vmax.xlane.f32.xlu1 %v2770_v1 }
 0x4b1   :  { %v1940_v3 = vadd.f32 %v1939_v2, %v1938_v0  ;;  %v1941_v4 = vpop.f32.mrb[50].mxu0 }
 0x4b2   :  { %v1942_v5 = vpop.f32.mrb[51].mxu0 }
 0x4b3   :  { %v1943_v6 = vadd.f32 %v1942_v5, %v1941_v4  ;;  %v1172_v7 = vadd.f32 %v1940_v3, %v2722_v17 }
 0x4b5   :  { %v2776_v8 = vsel %vm1268_vm0, %v1172_v7, -1e+30  ;;  %v1175_v9 = vadd.f32 %v1943_v6, %v2722_v17 }
 0x4b6   :  { %1317 = vmax.xlane.f32.xlu0 %v2776_v8 }
 0x4b7   :  { %v1944_v12 = vpop.f32.mrb[52].mxu0  ;;  %v2782_v38 = vsel %vm1268_vm0, %v1175_v9, -1e+30 }
 0x4b8   :  { %v1945_v39 = vpop.f32.mrb[53].mxu0  ;;  %1319 = vmax.xlane.f32.xlu1 %v2782_v38 }
 0x4b9   :  { %v1946_v42 = vadd.f32 %v1945_v39, %v1944_v12  ;;  %v1947_v49 = vpop.f32.mrb[54].mxu0 }
 0x4ba   :  { %v1948_v52 = vpop.f32.mrb[55].mxu0 }
 0x4bb   :  { %v1949_v10 = vadd.f32 %v1948_v52, %v1947_v49  ;;  %v1180_v14 = vadd.f32 %v1946_v42, %v2722_v17 }
 0x4bd   :  { %v2788_v51 = vsel %vm1268_vm0, %v1180_v14, -1e+30  ;;  %v1183_v53 = vadd.f32 %v1949_v10, %v2722_v17 }
 0x4be   :  { %1321 = vmax.xlane.f32.xlu0 %v2788_v51 }
 0x4bf   :  { %v1950_v55 = vpop.f32.mrb[56].mxu0  ;;  %v2794_v57 = vsel %vm1268_vm0, %v1183_v53, -1e+30 }
 0x4c0   :  { %v1951_v11 = vpop.f32.mrb[57].mxu0  ;;  %1323 = vmax.xlane.f32.xlu1 %v2794_v57 }
 0x4c1   :  { %v1952_v15 = vadd.f32 %v1951_v11, %v1950_v55  ;;  %v1953_v16 = vpop.f32.mrb[58].mxu0 }
 0x4c2   :  { %v1954_v18 = vpop.f32.mrb[59].mxu0 }
 0x4c3   :  { %v1955_v19 = vadd.f32 %v1954_v18, %v1953_v16  ;;  %v1188_v20 = vadd.f32 %v1952_v15, %v2722_v17 }
 0x4c5   :  { %v2800_v21 = vsel %vm1268_vm0, %v1188_v20, -1e+30  ;;  %v1191_v22 = vadd.f32 %v1955_v19, %v2722_v17 }
 0x4c6   :  { %1325 = vmax.xlane.f32.xlu0 %v2800_v21 }
 0x4c7   :  { %v1956_v25 = vpop.f32.mrb[60].mxu0  ;;  %v2806_v26 = vsel %vm1268_vm0, %v1191_v22, -1e+30 }
 0x4c8   :  { %v1957_v27 = vpop.f32.mrb[61].mxu0  ;;  %1327 = vmax.xlane.f32.xlu1 %v2806_v26 }
 0x4c9   :  { %v1958_v28 = vadd.f32 %v1957_v27, %v1956_v25  ;;  %v1959_v30 = vpop.f32.mrb[62].mxu0 }
 0x4ca   :  { %v1960_v31 = vpop.f32.mrb[63].mxu0 }
 0x4cb   :  { %v1961_v32 = vadd.f32 %v1960_v31, %v1959_v30  ;;  %v1196_v33 = vadd.f32 %v1958_v28, %v2722_v17 }
 0x4cd   :  { %v2812_v35 = vsel %vm1268_vm0, %v1196_v33, -1e+30  ;;  %v1199_v36 = vadd.f32 %v1961_v32, %v2722_v17 }
 0x4ce   :  { %1329 = vmax.xlane.f32.xlu0 %v2812_v35 }
 0x4cf   :  { %v1962_v37 = vpop.f32.mrb[64].mxu0  ;;  %v2818_v40 = vsel %vm1268_vm0, %v1199_v36, -1e+30 }
 0x4d0   :  { %v1963_v41 = vpop.f32.mrb[65].mxu0  ;;  %1331 = vmax.xlane.f32.xlu1 %v2818_v40 }
 0x4d1   :  { %v1964_v45 = vadd.f32 %v1963_v41, %v1962_v37  ;;  %v1965_v46 = vpop.f32.mrb[66].mxu0 }
 0x4d2   :  { %v1966_v47 = vpop.f32.mrb[67].mxu0 }
 0x4d3   :  { %v1967_v43 = vadd.f32 %v1966_v47, %v1965_v46  ;;  %v1204_v50 = vadd.f32 %v1964_v45, %v2722_v17 }
 0x4d5   :  { %v2824_v56 = vsel %vm1268_vm0, %v1204_v50, -1e+30  ;;  %v1207_v24 = vadd.f32 %v1967_v43, %v2722_v17 }
 0x4d6   :  { %1333 = vmax.xlane.f32.xlu0 %v2824_v56 }
 0x4d7   :  { %v1968_v58 = vpop.f32.mrb[68].mxu0  ;;  %v2830_v59 = vsel %vm1268_vm0, %v1207_v24, -1e+30 }
 0x4d8   :  { %v1969_v60 = vpop.f32.mrb[69].mxu0  ;;  %1335 = vmax.xlane.f32.xlu1 %v2830_v59 }
 0x4d9   :  { %v1970_v61 = vadd.f32 %v1969_v60, %v1968_v58  ;;  %v1971_v63 = vpop.f32.mrb[70].mxu0 }
 0x4da   :  { %v1972_v0 = vpop.f32.mrb[71].mxu0 }
 0x4db   :  { %v1973_v2 = vadd.f32 %v1972_v0, %v1971_v63  ;;  %v1212_v3 = vadd.f32 %v1970_v61, %v2722_v17 }
 0x4dd   :  { %v2836_v4 = vsel %vm1268_vm0, %v1212_v3, -1e+30  ;;  %v1215_v5 = vadd.f32 %v1973_v2, %v2722_v17 }
 0x4de   :  { %1337 = vmax.xlane.f32.xlu0 %v2836_v4 }
 0x4df   :  { %v1974_v6 = vpop.f32.mrb[72].mxu0  ;;  %v2842_v7 = vsel %vm1268_vm0, %v1215_v5, -1e+30 }
 0x4e0   :  { %v1975_v9 = vpop.f32.mrb[73].mxu0  ;;  %1339 = vmax.xlane.f32.xlu1 %v2842_v7 }
 0x4e1   :  { %v1976_v12 = vadd.f32 %v1975_v9, %v1974_v6  ;;  %v1977_v39 = vpop.f32.mrb[74].mxu0 }
 0x4e2   :  { %v1978_v42 = vpop.f32.mrb[75].mxu0 }
 0x4e3   :  { %v1979_v49 = vadd.f32 %v1978_v42, %v1977_v39  ;;  %v1220_v52 = vadd.f32 %v1976_v12, %v2722_v17 }
 0x4e5   :  { %v2848_v10 = vsel %vm1268_vm0, %v1220_v52, -1e+30  ;;  %v1223_v14 = vadd.f32 %v1979_v49, %v2722_v17 }
 0x4e6   :  { %1341 = vmax.xlane.f32.xlu0 %v2848_v10 }
 0x4e7   :  { %v1980_v53 = vpop.f32.mrb[76].mxu0  ;;  %v2854_v55 = vsel %vm1268_vm0, %v1223_v14, -1e+30 }
 0x4e8   :  { %v1981_v11 = vpop.f32.mrb[77].mxu0  ;;  %1343 = vmax.xlane.f32.xlu1 %v2854_v55 }
 0x4e9   :  { %v1982_v15 = vadd.f32 %v1981_v11, %v1980_v53  ;;  %v1983_v16 = vpop.f32.mrb[78].mxu0 }
 0x4ea   :  { %v1984_v18 = vpop.f32.mrb[79].mxu0 }
 0x4eb   :  { %v1985_v19 = vadd.f32 %v1984_v18, %v1983_v16  ;;  %v1228_v20 = vadd.f32 %v1982_v15, %v2722_v17 }
 0x4ed   :  { %v2860_v22 = vsel %vm1268_vm0, %v1228_v20, -1e+30  ;;  %v1231_v25 = vadd.f32 %v1985_v19, %v2722_v17 }
 0x4ee   :  { %1345 = vmax.xlane.f32.xlu0 %v2860_v22 }
 0x4ef   :  { %v1986_v27 = vpop.f32.mrb[80].mxu0  ;;  %v2866_v28 = vsel %vm1268_vm0, %v1231_v25, -1e+30 }
 0x4f0   :  { %v1987_v30 = vpop.f32.mrb[81].mxu0  ;;  %1347 = vmax.xlane.f32.xlu1 %v2866_v28 }
 0x4f1   :  { %v1988_v31 = vadd.f32 %v1987_v30, %v1986_v27  ;;  %v1989_v32 = vpop.f32.mrb[82].mxu0 }
 0x4f2   :  { %v1990_v33 = vpop.f32.mrb[83].mxu0 }
 0x4f3   :  { %v1991_v36 = vadd.f32 %v1990_v33, %v1989_v32  ;;  %v1236_v37 = vadd.f32 %v1988_v31, %v2722_v17 }
 0x4f5   :  { %v2872_v41 = vsel %vm1268_vm0, %v1236_v37, -1e+30  ;;  %v1239_v45 = vadd.f32 %v1991_v36, %v2722_v17 }
 0x4f6   :  { %1349 = vmax.xlane.f32.xlu0 %v2872_v41 }
 0x4f7   :  { %v1992_v46 = vpop.f32.mrb[84].mxu0  ;;  %v2878_v47 = vsel %vm1268_vm0, %v1239_v45, -1e+30 }
 0x4f8   :  { %v1993_v43 = vpop.f32.mrb[85].mxu0  ;;  %1351 = vmax.xlane.f32.xlu1 %v2878_v47 }
 0x4f9   :  { %v1994_v50 = vadd.f32 %v1993_v43, %v1992_v46  ;;  %v1995_v24 = vpop.f32.mrb[86].mxu0 }
 0x4fa   :  { %v1996_v58 = vpop.f32.mrb[87].mxu0 }
 0x4fb   :  { %v1997_v60 = vadd.f32 %v1996_v58, %v1995_v24  ;;  %v1244_v61 = vadd.f32 %v1994_v50, %v2722_v17 }
 0x4fd   :  { %v2884_v63 = vsel %vm1268_vm0, %v1244_v61, -1e+30  ;;  %v1247_v0 = vadd.f32 %v1997_v60, %v2722_v17 }
 0x4fe   :  { %1353 = vmax.xlane.f32.xlu0 %v2884_v63 }
 0x4ff   :  { %v1998_v2 = vpop.f32.mrb[88].mxu0  ;;  %v2890_v3 = vsel %vm1268_vm0, %v1247_v0, -1e+30 }
 0x500   :  { %v1999_v5 = vpop.f32.mrb[89].mxu0  ;;  %1355 = vmax.xlane.f32.xlu1 %v2890_v3 }
 0x501   :  { %v2000_v6 = vadd.f32 %v1999_v5, %v1998_v2  ;;  %v2001_v9 = vpop.f32.mrb[90].mxu0 }
 0x502   :  { %v2002_v12 = vpop.f32.mrb[91].mxu0 }
 0x503   :  { %v2003_v39 = vadd.f32 %v2002_v12, %v2001_v9  ;;  %v1252_v42 = vadd.f32 %v2000_v6, %v2722_v17 }
 0x505   :  { %v2896_v49 = vsel %vm1268_vm0, %v1252_v42, -1e+30  ;;  %v1255_v52 = vadd.f32 %v2003_v39, %v2722_v17 }
 0x506   :  { %1357 = vmax.xlane.f32.xlu0 %v2896_v49 }
 0x507   :  { %v2004_v14 = vpop.f32.mrb[92].mxu0  ;;  %v2902_v53 = vsel %vm1268_vm0, %v1255_v52, -1e+30 }
 0x508   :  { %v2005_v11 = vpop.f32.mrb[93].mxu0  ;;  %1359 = vmax.xlane.f32.xlu1 %v2902_v53 }
 0x509   :  { %v2006_v15 = vadd.f32 %v2005_v11, %v2004_v14  ;;  %v2007_v16 = vpop.f32.mrb[94].mxu0 }
 0x50a   :  { %v2008_v18 = vpop.f32.mrb[95].mxu0 }
 0x50b   :  { %v2009_v19 = vadd.f32 %v2008_v18, %v2007_v16  ;;  %v1260_v20 = vadd.f32 %v2006_v15, %v2722_v17 }
 0x50d   :  { %v2908_v25 = vsel %vm1268_vm0, %v1260_v20, -1e+30  ;;  %v1263_v27 = vadd.f32 %v2009_v19, %v2722_v17 }
 0x50e   :  { %1361 = vmax.xlane.f32.xlu0 %v2908_v25 }
 0x50f   :  { %v2914_v30 = vsel %vm1268_vm0, %v1263_v27, -1e+30 }
 0x510   :  { %1363 = vmax.xlane.f32.xlu1 %v2914_v30 }
 0x523   :  { %v1302_v31 = vpop.xlane.xlu0 %1301 }
 0x524   :  { %v2918_v32 = vsub.f32 %v2728_v23, %v1302_v31 }
 0x526   :  { %v1397_v33 = vmul.f32 1.442695, %v2918_v32 }
 0x527   :  { %v1304_v36 = vpop.xlane.xlu0 %1303 }
 0x528   :  { %2195 = vpow2.f32 %v1397_v33  ;;  %v2922_v37 = vsub.f32 %v2734_v29, %v1304_v36 }
 0x52a   :  { %v1399_v17 = vmul.f32 1.442695, %v2922_v37 }
 0x52b   :  { %v1306_v45 = vpop.xlane.xlu1 %1305 }
 0x52c   :  { %2197 = vpow2.f32 %v1399_v17  ;;  %v2926_v13 = vsub.f32 %v2740_v34, %v1306_v45 }
 0x52e   :  { %v1401_v46 = vmul.f32 1.442695, %v2926_v13 }
 0x52f   :  { %v1308_v43 = vpop.xlane.xlu1 %1307 }
 0x530   :  { %2199 = vpow2.f32 %v1401_v46  ;;  %v2930_v23 = vsub.f32 %v2746_v44, %v1308_v43 }
 0x532   :  { %v2196_v50 = vpop.eup %2195  ;;  %v1403_v24 = vmul.f32 1.442695, %v2930_v23 }
 0x533   :  { %1461 = vadd.xlane.f32.xlu0 %v2196_v50  ;;  %v1310_v29 = vpop.xlane.xlu0 %1309 }
 0x534   :  { %2201 = vpow2.f32 %v1403_v24  ;;  %v2934_v58 = vsub.f32 %v2752_v48, %v1310_v29 }
 0x535   :  { %v1312_v60 = vpop.xlane.xlu1 %1311 }
 0x536   :  { %v2198_v61 = vpop.eup %2197  ;;  %v1405_v34 = vmul.f32 1.442695, %v2934_v58  ;;  %v2938_v0 = vsub.f32 %v2758_v54, %v1312_v60 }
 0x537   :  { %1463 = vadd.xlane.f32.xlu1 %v2198_v61 }
 0x538   :  { %2203 = vpow2.f32 %v1405_v34  ;;  %v1407_v44 = vmul.f32 1.442695, %v2938_v0 }
 0x53a   :  { %v2200_v2 = vpop.eup %2199  ;;  %2205 = vpow2.f32 %v1407_v44 }
 0x53b   :  { %1465 = vadd.xlane.f32.xlu0 %v2200_v2  ;;  %v1314_v5 = vpop.xlane.xlu0 %1313 }
 0x53c   :  { %v2942_v6 = vsub.f32 %v2764_v62, %v1314_v5 }
 0x53d   :  { %v1316_v48 = vpop.xlane.xlu1 %1315 }
 0x53e   :  { %v2202_v9 = vpop.eup %2201  ;;  %v1409_v12 = vmul.f32 1.442695, %v2942_v6  ;;  %v2946_v39 = vsub.f32 %v2770_v1, %v1316_v48 }
 0x53f   :  { %1467 = vadd.xlane.f32.xlu1 %v2202_v9 }
 0x540   :  { %2207 = vpow2.f32 %v1409_v12  ;;  %v1411_v54 = vmul.f32 1.442695, %v2946_v39 }
 0x542   :  { %v2204_v42 = vpop.eup %2203  ;;  %2209 = vpow2.f32 %v1411_v54 }
 0x543   :  { %1469 = vadd.xlane.f32.xlu0 %v2204_v42  ;;  %v1318_v52 = vpop.xlane.xlu0 %1317 }
 0x544   :  { %v2206_v14 = vpop.eup %2205  ;;  %v2950_v11 = vsub.f32 %v2776_v8, %v1318_v52 }
 0x545   :  { %v1320_v62 = vpop.xlane.xlu1 %1319  ;;  %1471 = vadd.xlane.f32.xlu1 %v2206_v14 }
 0x546   :  { %v1413_v15 = vmul.f32 1.442695, %v2950_v11  ;;  %v2954_v16 = vsub.f32 %v2782_v38, %v1320_v62 }
 0x548   :  { %2211 = vpow2.f32 %v1413_v15  ;;  %v1415_v1 = vmul.f32 1.442695, %v2954_v16 }
 0x54a   :  { %v2208_v18 = vpop.eup %2207  ;;  %2213 = vpow2.f32 %v1415_v1 }
 0x54b   :  { %1473 = vadd.xlane.f32.xlu0 %v2208_v18  ;;  %v1322_v19 = vpop.xlane.xlu0 %1321 }
 0x54c   :  { %v2210_v20 = vpop.eup %2209  ;;  %v2958_v27 = vsub.f32 %v2788_v51, %v1322_v19 }
 0x54d   :  { %v1324_v8 = vpop.xlane.xlu1 %1323  ;;  %1475 = vadd.xlane.f32.xlu1 %v2210_v20 }
 0x54e   :  { %v1417_v31 = vmul.f32 1.442695, %v2958_v27  ;;  %v2962_v33 = vsub.f32 %v2794_v57, %v1324_v8 }
 0x550   :  { %2215 = vpow2.f32 %v1417_v31  ;;  %v1419_v38 = vmul.f32 1.442695, %v2962_v33 }
 0x552   :  { %v2212_v36 = vpop.eup %2211  ;;  %2217 = vpow2.f32 %v1419_v38 }
 0x553   :  { %1477 = vadd.xlane.f32.xlu0 %v2212_v36  ;;  %v1326_v17 = vpop.xlane.xlu0 %1325 }
 0x554   :  { %v2214_v45 = vpop.eup %2213  ;;  %v2966_v46 = vsub.f32 %v2800_v21, %v1326_v17 }
 0x555   :  { %v1328_v51 = vpop.xlane.xlu1 %1327  ;;  %1479 = vadd.xlane.f32.xlu1 %v2214_v45 }
 0x556   :  { %v1421_v43 = vmul.f32 1.442695, %v2966_v46  ;;  %v2970_v50 = vsub.f32 %v2806_v26, %v1328_v51 }
 0x558   :  { %2219 = vpow2.f32 %v1421_v43  ;;  %v1423_v57 = vmul.f32 1.442695, %v2970_v50 }
 0x55a   :  { %v2216_v24 = vpop.eup %2215  ;;  %2221 = vpow2.f32 %v1423_v57 }
 0x55b   :  { %1481 = vadd.xlane.f32.xlu0 %v2216_v24  ;;  %v1330_v29 = vpop.xlane.xlu0 %1329 }
 0x55c   :  { %v2218_v60 = vpop.eup %2217  ;;  %v2974_v61 = vsub.f32 %v2812_v35, %v1330_v29 }
 0x55d   :  { %v1332_v21 = vpop.xlane.xlu1 %1331  ;;  %1483 = vadd.xlane.f32.xlu1 %v2218_v60 }
 0x55e   :  { %v1425_v34 = vmul.f32 1.442695, %v2974_v61  ;;  %v2978_v44 = vsub.f32 %v2818_v40, %v1332_v21 }
 0x560   :  { %2223 = vpow2.f32 %v1425_v34  ;;  %v1427_v26 = vmul.f32 1.442695, %v2978_v44 }
 0x562   :  { %v2220_v2 = vpop.eup %2219  ;;  %2225 = vpow2.f32 %v1427_v26 }
 0x563   :  { %1485 = vadd.xlane.f32.xlu0 %v2220_v2  ;;  %v1334_v5 = vpop.xlane.xlu0 %1333 }
 0x564   :  { %v2222_v48 = vpop.eup %2221  ;;  %v2982_v9 = vsub.f32 %v2824_v56, %v1334_v5 }
 0x565   :  { %v1336_v35 = vpop.xlane.xlu1 %1335  ;;  %1487 = vadd.xlane.f32.xlu1 %v2222_v48 }
 0x566   :  { %v1429_v12 = vmul.f32 1.442695, %v2982_v9  ;;  %v2986_v54 = vsub.f32 %v2830_v59, %v1336_v35 }
 0x568   :  { %2227 = vpow2.f32 %v1429_v12  ;;  %v1431_v40 = vmul.f32 1.442695, %v2986_v54 }
 0x56a   :  { %v2224_v42 = vpop.eup %2223  ;;  %2229 = vpow2.f32 %v1431_v40 }
 0x56b   :  { %1489 = vadd.xlane.f32.xlu0 %v2224_v42  ;;  %v1338_v52 = vpop.xlane.xlu0 %1337 }
 0x56c   :  { %v2226_v14 = vpop.eup %2225  ;;  %v2990_v62 = vsub.f32 %v2836_v4, %v1338_v52 }
 0x56d   :  { %v1340_v56 = vpop.xlane.xlu1 %1339  ;;  %1491 = vadd.xlane.f32.xlu1 %v2226_v14 }
 0x56e   :  { %v1433_v15 = vmul.f32 1.442695, %v2990_v62  ;;  %v2994_v1 = vsub.f32 %v2842_v7, %v1340_v56 }
 0x570   :  { %2231 = vpow2.f32 %v1433_v15  ;;  %v1435_v59 = vmul.f32 1.442695, %v2994_v1 }
 0x572   :  { %v2228_v18 = vpop.eup %2227  ;;  %2233 = vpow2.f32 %v1435_v59 }
 0x573   :  { %1493 = vadd.xlane.f32.xlu0 %v2228_v18  ;;  %v1342_v19 = vpop.xlane.xlu0 %1341 }
 0x574   :  { %v2230_v20 = vpop.eup %2229  ;;  %v2998_v8 = vsub.f32 %v2848_v10, %v1342_v19 }
 0x575   :  { %v1344_v4 = vpop.xlane.xlu1 %1343  ;;  %1495 = vadd.xlane.f32.xlu1 %v2230_v20 }
 0x576   :  { %v1437_v31 = vmul.f32 1.442695, %v2998_v8  ;;  %v3002_v38 = vsub.f32 %v2854_v55, %v1344_v4 }
 0x578   :  { %2235 = vpow2.f32 %v1437_v31  ;;  %v1439_v7 = vmul.f32 1.442695, %v3002_v38 }
 0x57a   :  { %v2232_v36 = vpop.eup %2231  ;;  %2237 = vpow2.f32 %v1439_v7 }
 0x57b   :  { %1497 = vadd.xlane.f32.xlu0 %v2232_v36  ;;  %v1346_v17 = vpop.xlane.xlu0 %1345 }
 0x57c   :  { %v2234_v45 = vpop.eup %2233  ;;  %v3006_v51 = vsub.f32 %v2860_v22, %v1346_v17 }
 0x57d   :  { %v1348_v10 = vpop.xlane.xlu1 %1347  ;;  %1499 = vadd.xlane.f32.xlu1 %v2234_v45 }
 0x57e   :  { %v1441_v43 = vmul.f32 1.442695, %v3006_v51  ;;  %v3010_v57 = vsub.f32 %v2866_v28, %v1348_v10 }
 0x580   :  { %2239 = vpow2.f32 %v1441_v43  ;;  %v1443_v55 = vmul.f32 1.442695, %v3010_v57 }
 0x582   :  { %v2236_v24 = vpop.eup %2235  ;;  %2241 = vpow2.f32 %v1443_v55 }
 0x583   :  { %1501 = vadd.xlane.f32.xlu0 %v2236_v24  ;;  %v1350_v29 = vpop.xlane.xlu0 %1349 }
 0x584   :  { %v2238_v60 = vpop.eup %2237  ;;  %v3014_v21 = vsub.f32 %v2872_v41, %v1350_v29 }
 0x585   :  { %v1352_v22 = vpop.xlane.xlu1 %1351  ;;  %1503 = vadd.xlane.f32.xlu1 %v2238_v60 }
 0x586   :  { %v1445_v34 = vmul.f32 1.442695, %v3014_v21  ;;  %v3018_v26 = vsub.f32 %v2878_v47, %v1352_v22 }
 0x588   :  { %2243 = vpow2.f32 %v1445_v34  ;;  %v1447_v28 = vmul.f32 1.442695, %v3018_v26 }
 0x58a   :  { %v2240_v2 = vpop.eup %2239  ;;  %2245 = vpow2.f32 %v1447_v28 }
 0x58b   :  { %1505 = vadd.xlane.f32.xlu0 %v2240_v2  ;;  %v1354_v5 = vpop.xlane.xlu0 %1353 }
 0x58c   :  { %v2242_v48 = vpop.eup %2241  ;;  %v3022_v35 = vsub.f32 %v2884_v63, %v1354_v5 }
 0x58d   :  { %v1356_v41 = vpop.xlane.xlu1 %1355  ;;  %1507 = vadd.xlane.f32.xlu1 %v2242_v48 }
 0x58e   :  { %v1449_v12 = vmul.f32 1.442695, %v3022_v35  ;;  %v3026_v40 = vsub.f32 %v2890_v3, %v1356_v41 }
 0x590   :  { %2247 = vpow2.f32 %v1449_v12  ;;  %v1451_v47 = vmul.f32 1.442695, %v3026_v40 }
 0x592   :  { %v2244_v42 = vpop.eup %2243  ;;  %2249 = vpow2.f32 %v1451_v47 }
 0x593   :  { %1509 = vadd.xlane.f32.xlu0 %v2244_v42  ;;  %v1358_v52 = vpop.xlane.xlu0 %1357 }
 0x594   :  { %v2246_v14 = vpop.eup %2245  ;;  %v3030_v56 = vsub.f32 %v2896_v49, %v1358_v52 }
 0x595   :  { %v1360_v63 = vpop.xlane.xlu1 %1359  ;;  %1511 = vadd.xlane.f32.xlu1 %v2246_v14 }
 0x596   :  { %v1453_v15 = vmul.f32 1.442695, %v3030_v56  ;;  %v3034_v59 = vsub.f32 %v2902_v53, %v1360_v63 }
 0x598   :  { %2251 = vpow2.f32 %v1453_v15  ;;  %v1455_v3 = vmul.f32 1.442695, %v3034_v59 }
 0x59a   :  { %v2248_v18 = vpop.eup %2247  ;;  %2253 = vpow2.f32 %v1455_v3 }
 0x59b   :  { %1513 = vadd.xlane.f32.xlu0 %v2248_v18  ;;  %v1362_v19 = vpop.xlane.xlu0 %1361 }
 0x59c   :  { %v2250_v20 = vpop.eup %2249  ;;  %v3038_v4 = vsub.f32 %v2908_v25, %v1362_v19 }
 0x59d   :  { %v1364_v49 = vpop.xlane.xlu1 %1363  ;;  %1515 = vadd.xlane.f32.xlu1 %v2250_v20 }
 0x59e   :  { %v1457_v31 = vmul.f32 1.442695, %v3038_v4  ;;  %v3042_v7 = vsub.f32 %v2914_v30, %v1364_v49 }
 0x5a0   :  { %2255 = vpow2.f32 %v1457_v31  ;;  %v1459_v53 = vmul.f32 1.442695, %v3042_v7 }
 0x5a2   :  { %v2252_v36 = vpop.eup %2251  ;;  %2257 = vpow2.f32 %v1459_v53 }
 0x5a3   :  { %1517 = vadd.xlane.f32.xlu0 %v2252_v36 }
 0x5a4   :  { %v2254_v17 = vpop.eup %2253 }
 0x5a5   :  { %1519 = vadd.xlane.f32.xlu1 %v2254_v17 }
 0x5aa   :  { %v2256_v45 = vpop.eup %2255 }
 0x5ab   :  { %1521 = vadd.xlane.f32.xlu0 %v2256_v45 }
 0x5ac   :  { %v2258_v10 = vpop.eup %2257 }
 0x5ad   :  { %1523 = vadd.xlane.f32.xlu1 %v2258_v10 }
 0x5c0   :  { %v1462_v25 = vpop.xlane.xlu0 %1461 }
 0x5c1   :  { %2259 = vlog2.f32 %v1462_v25 }
 0x5c4   :  { %v1464_v43 = vpop.xlane.xlu1 %1463 }
 0x5c5   :  { %2261 = vlog2.f32 %v1464_v43 }
 0x5c8   :  { %v1466_v55 = vpop.xlane.xlu0 %1465 }
 0x5c9   :  { %2263 = vlog2.f32 %v1466_v55 }
 0x5cb   :  { %v2260_v30 = vpop.eup %2259 }
 0x5cc   :  { %v1526_v24 = vmul.f32 0.6931472, %v2260_v30  ;;  %v1468_v29 = vpop.xlane.xlu1 %1467 }
 0x5cd   :  { %2265 = vlog2.f32 %v1468_v29 }
 0x5ce   :  { %v1589_v60 = vsub.f32 %v2918_v32, %v1526_v24 }
 0x5cf   :  { %v2262_v22 = vpop.eup %2261 }
 0x5d0   :  { %1621 = vst [vmem:[#allocation10] sm:$0xff] %v1589_v60  ;;  %v1528_v34 = vmul.f32 0.6931472, %v2262_v22  ;;  %v1470_v28 = vpop.xlane.xlu0 %1469 }
 0x5d1   :  { %2267 = vlog2.f32 %v1470_v28 }
 0x5d2   :  { %v1590_v2 = vsub.f32 %v2922_v37, %v1528_v34  ;;  %v1472_v5 = vpop.xlane.xlu1 %1471 }
 0x5d3   :  { %v2264_v48 = vpop.eup %2263  ;;  %2269 = vlog2.f32 %v1472_v5 }
 0x5d4   :  { %1622 = vst [vmem:[#allocation10 + $0x8] sm:$0xff] %v1590_v2  ;;  %v1530_v41 = vmul.f32 0.6931472, %v2264_v48 }
 0x5d6   :  { %v1591_v12 = vsub.f32 %v2926_v13, %v1530_v41 }
 0x5d7   :  { %v2266_v47 = vpop.eup %2265 }
 0x5d8   :  { %1623 = vst [vmem:[#allocation10 + $0x10] sm:$0xff] %v1591_v12  ;;  %v1532_v42 = vmul.f32 0.6931472, %v2266_v47  ;;  %v1474_v52 = vpop.xlane.xlu0 %1473 }
 0x5d9   :  { %2271 = vlog2.f32 %v1474_v52 }
 0x5da   :  { %v1592_v32 = vsub.f32 %v2930_v23, %v1532_v42  ;;  %v1476_v14 = vpop.xlane.xlu1 %1475 }
 0x5db   :  { %v2268_v63 = vpop.eup %2267  ;;  %2273 = vlog2.f32 %v1476_v14 }
 0x5dc   :  { %1624 = vst [vmem:[#allocation10 + $0x18] sm:$0xff] %v1592_v32  ;;  %v1534_v15 = vmul.f32 0.6931472, %v2268_v63 }
 0x5dd   :  { %v2270_v37 = vpop.eup %2269 }
 0x5de   :  { %v1593_v3 = vsub.f32 %v2934_v58, %v1534_v15  ;;  %v1536_v18 = vmul.f32 0.6931472, %v2270_v37 }
 0x5e0   :  { %1625 = vst [vmem:[#allocation10 + $0x20] sm:$0xff] %v1593_v3  ;;  %v1594_v19 = vsub.f32 %v2938_v0, %v1536_v18  ;;  %v1478_v13 = vpop.xlane.xlu0 %1477 }
 0x5e1   :  { %2275 = vlog2.f32 %v1478_v13 }
 0x5e2   :  { %1626 = vst [vmem:[#allocation10 + $0x28] sm:$0xff] %v1594_v19  ;;  %v1480_v20 = vpop.xlane.xlu1 %1479 }
 0x5e3   :  { %v2272_v49 = vpop.eup %2271  ;;  %2277 = vlog2.f32 %v1480_v20 }
 0x5e4   :  { %v1538_v31 = vmul.f32 0.6931472, %v2272_v49 }
 0x5e5   :  { %v2274_v23 = vpop.eup %2273 }
 0x5e6   :  { %v1595_v53 = vsub.f32 %v2942_v6, %v1538_v31  ;;  %v1540_v36 = vmul.f32 0.6931472, %v2274_v23 }
 0x5e8   :  { %1627 = vst [vmem:[#allocation10 + $0x30] sm:$0xff] %v1595_v53  ;;  %v1596_v17 = vsub.f32 %v2946_v39, %v1540_v36  ;;  %v1482_v45 = vpop.xlane.xlu0 %1481 }
 0x5e9   :  { %2279 = vlog2.f32 %v1482_v45 }
 0x5ea   :  { %1628 = vst [vmem:[#allocation10 + $0x38] sm:$0xff] %v1596_v17  ;;  %v1484_v58 = vpop.xlane.xlu1 %1483 }
 0x5eb   :  { %v2276_v10 = vpop.eup %2275  ;;  %2281 = vlog2.f32 %v1484_v58 }
 0x5ec   :  { %v1542_v0 = vmul.f32 0.6931472, %v2276_v10 }
 0x5ed   :  { %v2278_v25 = vpop.eup %2277 }
 0x5ee   :  { %v1597_v43 = vsub.f32 %v2950_v11, %v1542_v0  ;;  %v1544_v55 = vmul.f32 0.6931472, %v2278_v25 }
 0x5f0   :  { %1629 = vst [vmem:[#allocation10 + $0x40] sm:$0xff] %v1597_v43  ;;  %v1598_v30 = vsub.f32 %v2954_v16, %v1544_v55  ;;  %v1486_v24 = vpop.xlane.xlu0 %1485 }
 0x5f1   :  { %2283 = vlog2.f32 %v1486_v24 }
 0x5f2   :  { %1630 = vst [vmem:[#allocation10 + $0x48] sm:$0xff] %v1598_v30  ;;  %v1488_v6 = vpop.xlane.xlu1 %1487 }
 0x5f3   :  { %v2280_v29 = vpop.eup %2279  ;;  %2285 = vlog2.f32 %v1488_v6 }
 0x5f4   :  { %v1546_v39 = vmul.f32 0.6931472, %v2280_v29 }
 0x5f5   :  { %v2282_v60 = vpop.eup %2281 }
 0x5f6   :  { %v1599_v22 = vsub.f32 %v2958_v27, %v1546_v39  ;;  %v1548_v34 = vmul.f32 0.6931472, %v2282_v60 }
 0x5f8   :  { %1631 = vst [vmem:[#allocation10 + $0x50] sm:$0xff] %v1599_v22  ;;  %v1600_v28 = vsub.f32 %v2962_v33, %v1548_v34  ;;  %v1490_v2 = vpop.xlane.xlu0 %1489 }
 0x5f9   :  { %2287 = vlog2.f32 %v1490_v2 }
 0x5fa   :  { %1632 = vst [vmem:[#allocation10 + $0x58] sm:$0xff] %v1600_v28  ;;  %v1492_v11 = vpop.xlane.xlu1 %1491 }
 0x5fb   :  { %v2284_v5 = vpop.eup %2283  ;;  %2289 = vlog2.f32 %v1492_v11 }
 0x5fc   :  { %v1550_v16 = vmul.f32 0.6931472, %v2284_v5 }
 0x5fd   :  { %v2286_v48 = vpop.eup %2285 }
 0x5fe   :  { %v1601_v41 = vsub.f32 %v2966_v46, %v1550_v16  ;;  %v1552_v12 = vmul.f32 0.6931472, %v2286_v48 }
 0x600   :  { %1633 = vst [vmem:[#allocation10 + $0x60] sm:$0xff] %v1601_v41  ;;  %v1602_v47 = vsub.f32 %v2970_v50, %v1552_v12  ;;  %v1494_v42 = vpop.xlane.xlu0 %1493 }
 0x601   :  { %2291 = vlog2.f32 %v1494_v42 }
 0x602   :  { %1634 = vst [vmem:[#allocation10 + $0x68] sm:$0xff] %v1602_v47  ;;  %v1496_v27 = vpop.xlane.xlu1 %1495 }
 0x603   :  { %v2288_v52 = vpop.eup %2287  ;;  %2293 = vlog2.f32 %v1496_v27 }
 0x604   :  { %v1554_v33 = vmul.f32 0.6931472, %v2288_v52 }
 0x605   :  { %v2290_v32 = vpop.eup %2289 }
 0x606   :  { %v1603_v14 = vsub.f32 %v2974_v61, %v1554_v33  ;;  %v1556_v63 = vmul.f32 0.6931472, %v2290_v32 }
 0x608   :  { %1635 = vst [vmem:[#allocation10 + $0x70] sm:$0xff] %v1603_v14  ;;  %v1604_v15 = vsub.f32 %v2978_v44, %v1556_v63  ;;  %v1498_v37 = vpop.xlane.xlu0 %1497 }
 0x609   :  { %2295 = vlog2.f32 %v1498_v37 }
 0x60a   :  { %1636 = vst [vmem:[#allocation10 + $0x78] sm:$0xff] %v1604_v15  ;;  %v1500_v46 = vpop.xlane.xlu1 %1499 }
 0x60b   :  { %v2292_v3 = vpop.eup %2291  ;;  %2297 = vlog2.f32 %v1500_v46 }
 0x60c   :  { %v1558_v50 = vmul.f32 0.6931472, %v2292_v3 }
 0x60d   :  { %v2294_v18 = vpop.eup %2293 }
 0x60e   :  { %v1605_v19 = vsub.f32 %v2982_v9, %v1558_v50  ;;  %v1560_v13 = vmul.f32 0.6931472, %v2294_v18 }
 0x610   :  { %1637 = vst [vmem:[#allocation10 + $0x80] sm:$0xff] %v1605_v19  ;;  %v1606_v20 = vsub.f32 %v2986_v54, %v1560_v13  ;;  %v1502_v49 = vpop.xlane.xlu0 %1501 }
 0x611   :  { %2299 = vlog2.f32 %v1502_v49 }
 0x612   :  { %1638 = vst [vmem:[#allocation10 + $0x88] sm:$0xff] %v1606_v20  ;;  %v1504_v61 = vpop.xlane.xlu1 %1503 }
 0x613   :  { %v2296_v31 = vpop.eup %2295  ;;  %2301 = vlog2.f32 %v1504_v61 }
 0x614   :  { %v1562_v44 = vmul.f32 0.6931472, %v2296_v31 }
 0x615   :  { %v2298_v23 = vpop.eup %2297 }
 0x616   :  { %v1607_v53 = vsub.f32 %v2990_v62, %v1562_v44  ;;  %v1564_v36 = vmul.f32 0.6931472, %v2298_v23 }
 0x618   :  { %1639 = vst [vmem:[#allocation10 + $0x90] sm:$0xff] %v1607_v53  ;;  %v1608_v17 = vsub.f32 %v2994_v1, %v1564_v36  ;;  %v1506_v45 = vpop.xlane.xlu0 %1505 }
 0x619   :  { %2303 = vlog2.f32 %v1506_v45 }
 0x61a   :  { %1640 = vst [vmem:[#allocation10 + $0x98] sm:$0xff] %v1608_v17  ;;  %v1508_v9 = vpop.xlane.xlu1 %1507 }
 0x61b   :  { %v2300_v58 = vpop.eup %2299  ;;  %2305 = vlog2.f32 %v1508_v9 }
 0x61c   :  { %v1566_v54 = vmul.f32 0.6931472, %v2300_v58 }
 0x61d   :  { %v2302_v10 = vpop.eup %2301 }
 0x61e   :  { %v1609_v0 = vsub.f32 %v2998_v8, %v1566_v54  ;;  %v1568_v25 = vmul.f32 0.6931472, %v2302_v10 }
 0x620   :  { %1641 = vst [vmem:[#allocation10 + $0xa0] sm:$0xff] %v1609_v0  ;;  %v1610_v43 = vsub.f32 %v3002_v38, %v1568_v25  ;;  %v1510_v55 = vpop.xlane.xlu0 %1509 }
 0x621   :  { %2307 = vlog2.f32 %v1510_v55 }
 0x622   :  { %1642 = vst [vmem:[#allocation10 + $0xa8] sm:$0xff] %v1610_v43  ;;  %v1512_v62 = vpop.xlane.xlu1 %1511 }
 0x623   :  { %v2304_v30 = vpop.eup %2303  ;;  %2309 = vlog2.f32 %v1512_v62 }
 0x624   :  { %v1570_v1 = vmul.f32 0.6931472, %v2304_v30 }
 0x625   :  { %v2306_v24 = vpop.eup %2305 }
 0x626   :  { %v1611_v6 = vsub.f32 %v3006_v51, %v1570_v1  ;;  %v1572_v29 = vmul.f32 0.6931472, %v2306_v24 }
 0x628   :  { %1643 = vst [vmem:[#allocation10 + $0xb0] sm:$0xff] %v1611_v6  ;;  %v1612_v39 = vsub.f32 %v3010_v57, %v1572_v29  ;;  %v1514_v60 = vpop.xlane.xlu0 %1513 }
 0x629   :  { %2311 = vlog2.f32 %v1514_v60 }
 0x62a   :  { %1644 = vst [vmem:[#allocation10 + $0xb8] sm:$0xff] %v1612_v39  ;;  %v1516_v8 = vpop.xlane.xlu1 %1515 }
 0x62b   :  { %v2308_v22 = vpop.eup %2307  ;;  %2313 = vlog2.f32 %v1516_v8 }
 0x62c   :  { %v1574_v38 = vmul.f32 0.6931472, %v2308_v22 }
 0x62d   :  { %v2310_v34 = vpop.eup %2309 }
 0x62e   :  { %v1613_v28 = vsub.f32 %v3014_v21, %v1574_v38  ;;  %v1576_v2 = vmul.f32 0.6931472, %v2310_v34 }
 0x630   :  { %1645 = vst [vmem:[#allocation10 + $0xc0] sm:$0xff] %v1613_v28  ;;  %v1614_v11 = vsub.f32 %v3018_v26, %v1576_v2  ;;  %v1518_v5 = vpop.xlane.xlu0 %1517 }
 0x631   :  { %2315 = vlog2.f32 %v1518_v5 }
 0x632   :  { %1646 = vst [vmem:[#allocation10 + $0xc8] sm:$0xff] %v1614_v11  ;;  %v1520_v51 = vpop.xlane.xlu1 %1519 }
 0x633   :  { %v2312_v16 = vpop.eup %2311  ;;  %2317 = vlog2.f32 %v1520_v51 }
 0x634   :  { %v1578_v57 = vmul.f32 0.6931472, %v2312_v16 }
 0x635   :  { %v2314_v48 = vpop.eup %2313 }
 0x636   :  { %v1615_v41 = vsub.f32 %v3022_v35, %v1578_v57  ;;  %v1580_v12 = vmul.f32 0.6931472, %v2314_v48 }
 0x638   :  { %1647 = vst [vmem:[#allocation10 + $0xd0] sm:$0xff] %v1615_v41  ;;  %v1616_v47 = vsub.f32 %v3026_v40, %v1580_v12  ;;  %v1522_v42 = vpop.xlane.xlu0 %1521 }
 0x639   :  { %2319 = vlog2.f32 %v1522_v42 }
 0x63a   :  { %1648 = vst [vmem:[#allocation10 + $0xd8] sm:$0xff] %v1616_v47  ;;  %v1524_v21 = vpop.xlane.xlu1 %1523 }
 0x63b   :  { %v2316_v27 = vpop.eup %2315  ;;  %2321 = vlog2.f32 %v1524_v21 }
 0x63c   :  { %v1582_v26 = vmul.f32 0.6931472, %v2316_v27 }
 0x63d   :  { %v2318_v52 = vpop.eup %2317 }
 0x63e   :  { %v1617_v33 = vsub.f32 %v3030_v56, %v1582_v26  ;;  %v1584_v32 = vmul.f32 0.6931472, %v2318_v52 }
 0x640   :  { %1649 = vst [vmem:[#allocation10 + $0xe0] sm:$0xff] %v1617_v33  ;;  %v1618_v14 = vsub.f32 %v3034_v59, %v1584_v32 }
 0x642   :  { %1650 = vst [vmem:[#allocation10 + $0xe8] sm:$0xff] %v1618_v14 }
 0x643   :  { %v2320_v35 = vpop.eup %2319 }
 0x644   :  { %v1586_v63 = vmul.f32 0.6931472, %v2320_v35 }
 0x645   :  { %v2322_v15 = vpop.eup %2321 }
 0x646   :  { %v1619_v40 = vsub.f32 %v3038_v4, %v1586_v63  ;;  %v1588_v37 = vmul.f32 0.6931472, %v2322_v15 }
 0x648   :  { %1651 = vst [vmem:[#allocation10 + $0xf0] sm:$0xff] %v1619_v40  ;;  %v1620_v46 = vsub.f32 %v3042_v7, %v1588_v37 }
 0x64a   :  { %1652 = vst [vmem:[#allocation10 + $0xf8] sm:$0xff] %v1620_v46 }
 0x64b   :  { %2422 = shalt.err (!%p2419_p8)
}
 0x64c   :  { %s2423_s29 = scalar_lea.hbm %s3098_s6, 4096 }
 0x64d   :  { %p2424_p9 = scmp.ne.s32.totalorder %s3098_s6, %s2423_s29  ;;  %p2427_p10 = scmp.lt.u32.totalorder %s2423_s29, %s3098_s6 }
 0x64f   :  { %p2429_p11 = pnand %p2427_p10, %p2424_p9 }
 0x651   :  { %2432 = shalt.err (!%p2429_p11)
}
 0x652   :  { %1664 = dma.vmem_to_hbm [thread:$0]  %s1659_s25, 4096, %s3098_s6, [#allocation4], %s2445_s1, %s2445_s1, %s2446_s21  }
 0x653   :  { %2439 = dma.done.wait [#allocation4], 4096  }
 0x654   :  { %2440 = vsyncadd [#allocation4], 4294963200 }
 0x655   :  { %1668 = vsyncpa [#allocation3], 1 }
 0x656   :  { %1669 = vsyncpa [#allocation6], 1 }
 0x657   :  { %1670 = vsyncpa [#allocation9], 1 }
 0x658   :  { %1671 = vsyncpa [#allocation4], 1 }

</bundles_post_ra>
